<compile_context>
chip_gen: v7x
topology: tpu7x:2x2x1
jax: 0.10.0
libtpu: 0.0.40
codegen_flags: <defaults>
</compile_context>

<pallas_src>
import jax
import jax.numpy as jnp
import numpy as np
from jax.experimental import pallas as pl
from jax.experimental.pallas import tpu as pltpu


# ----------------------------------------------------------------------------
# Pallas kernel: shared-MLP (two folded conv1x1+BN+ReLU) -> max-pool -> mask
# ----------------------------------------------------------------------------
def _make_sa_kernel(TP, S):
    def kernel(feat_ref, mask_ref, w1_ref, b1_ref, w2_ref, b2_ref, out_ref):
        # feat_ref: (Ci, S*TP) bf16 — points/samples lane-dense.
        # mask_ref: (1, TP) f32; w1: (H, Ci) f32; b1: (H, 1); w2: (Co, H); b2: (Co, 1)
        x = feat_ref[...]                                            # (Ci, S*TP) bf16
        w1 = w1_ref[...].astype(jnp.bfloat16)                        # keep big operand bf16
        h = jnp.dot(w1, x, preferred_element_type=jnp.float32) + b1_ref[...]
        h = jnp.maximum(h, 0.0)                                      # (H, S*TP) f32
        y = jnp.dot(w2_ref[...], h, preferred_element_type=jnp.float32) + b2_ref[...]
        y = jnp.maximum(y, 0.0)                                      # (Co, S*TP) f32
        # Max-pool over nsample: S-1 elementwise maxes of lane-aligned (Co, TP) slabs.
        pooled = y[:, :TP]
        for s in range(1, S):
            pooled = jnp.maximum(pooled, y[:, s * TP:(s + 1) * TP])
        # Mask after the pool (equivalent: binary mask is constant over nsample).
        out_ref[...] = pooled * mask_ref[...]                        # (Co, TP) lane-dense store
    return kernel


# ----------------------------------------------------------------------------
# Tile-size selection (generation-aware VMEM budget)
# ----------------------------------------------------------------------------
def _round_up(x, m):
    return (x + m - 1) // m * m


def _vmem_capacity_bytes():
    try:
        return int(pltpu.get_tpu_info().vmem_capacity_bytes)
    except Exception:
        return 64 * 1024 * 1024   # conservative (v7x per-TC VMEM)


def _block_vmem_bytes(tp, S, Ci, H, Co):
    """What actually lives in VMEM per grid step (incl. padding + f32 intermediates)."""
    lanes = S * tp
    feat = 2 * _round_up(Ci, 16) * lanes * 2                 # bf16 input block, double-buffered
    inter = (_round_up(H, 8) + _round_up(Co, 8)) * lanes * 4  # f32 h, y
    outb = 2 * _round_up(Co, 8) * tp * 4                      # f32 output block, double-buffered
    maskb = 2 * 8 * _round_up(tp, 128) * 4
    return feat + inter + outb + maskb


def _pick_tp(P, S, Ci, H, Co, batch, budget_bytes):
    """Largest point-tile dividing P (lane-aligned if possible) that fits the budget."""
    cands = [d for d in range(P, 0, -1) if P % d == 0 and (d % 128 == 0 or d == P)]
    tp = next((d for d in cands if _block_vmem_bytes(d, S, Ci, H, Co) <= budget_bytes),
              cands[-1])
    # v7x has 2 TensorCores: keep >=2 steps on a "parallel" axis when B == 1.
    if batch < 2 and tp == P:
        for d in cands:
            if d < P:
                tp = d
                break
    return tp


# ----------------------------------------------------------------------------
# Wrapper around pallas_call
# ----------------------------------------------------------------------------
def sa_mlp_pool(grouped, mask, w1, b1, w2, b2):
    """grouped: (B, P, S, Ci) f32, mask: (B, 1, P) f32,
    w1: (H, Ci) f32, b1: (H, 1), w2: (Co, H), b2: (Co, 1)  ->  (B, Co, P) f32."""
    B, P, S, Ci = grouped.shape
    H = w1.shape[0]
    Co = w2.shape[0]

    cap = _vmem_capacity_bytes()
    TP = _pick_tp(P, S, Ci, H, Co, B, cap // 3)
    nblk = P // TP

    # Lane-dense layout: last axis ordered [tile, sample, point-in-tile] so each
    # grid block is exactly (Ci, S*TP) with the TP points lane-aligned.
    # TODO(synk): fuse the ball-query gather into the kernel (scalar-prefetched
    # idx + manual make_async_copy from an HBM (Ci, N) slab) so the
    # nsample-duplicated tensor is never materialized in HBM; also consider
    # merging the radius branches into a single pallas_call.
    feat = (grouped.reshape(B, nblk, TP, S, Ci)
                   .transpose(0, 4, 1, 3, 2)               # (B, Ci, nblk, S, TP)
                   .reshape(B, Ci, S * P)
                   .astype(jnp.bfloat16))

    kernel = _make_sa_kernel(TP, S)
    flops = 2 * B * P * S * (Ci * H + H * Co)
    bytes_accessed = (B * Ci * S * P * 2 + B * P * 4 + B * Co * P * 4
                      + (w1.size + b1.size + w2.size + b2.size) * 4)

    return pl.pallas_call(
        kernel,
        out_shape=jax.ShapeDtypeStruct((B, Co, P), jnp.float32),
        grid=(B, nblk),
        in_specs=[
            pl.BlockSpec((pl.Squeezed(), Ci, S * TP), lambda b, p: (b, 0, p)),
            pl.BlockSpec((pl.Squeezed(), 1, TP), lambda b, p: (b, 0, p)),
            pl.BlockSpec((H, Ci), lambda b, p: (0, 0)),
            pl.BlockSpec((H, 1), lambda b, p: (0, 0)),
            pl.BlockSpec((Co, H), lambda b, p: (0, 0)),
            pl.BlockSpec((Co, 1), lambda b, p: (0, 0)),
        ],
        out_specs=pl.BlockSpec((pl.Squeezed(), Co, TP), lambda b, p: (b, 0, p)),
        compiler_params=pltpu.CompilerParams(
            dimension_semantics=("parallel", "parallel"),
            vmem_limit_bytes=min(cap * 3 // 4, 96 * 1024 * 1024),
        ),
        cost_estimate=pl.CostEstimate(
            flops=int(flops), transcendentals=0, bytes_accessed=int(bytes_accessed)),
    )(feat, mask, w1, b1, w2, b2)


# ----------------------------------------------------------------------------
# Plain-JAX glue: furthest point sampling, ball query, grouping
# ----------------------------------------------------------------------------
def furthest_point_sample(xyz, npoint):
    """xyz: (B, N, 3) -> (B, npoint) int32 indices."""
    B, N, _ = xyz.shape

    def body(i, state):
        idxs, dist, farthest = state
        idxs = idxs.at[:, i].set(farthest)
        centroid = jnp.take_along_axis(xyz, farthest[:, None, None], axis=1)  # (B,1,3)
        d = jnp.sum((xyz - centroid) ** 2, axis=-1)                           # (B,N)
        dist = jnp.minimum(dist, d)
        farthest = jnp.argmax(dist, axis=-1).astype(jnp.int32)
        return idxs, dist, farthest

    idxs0 = jnp.zeros((B, npoint), dtype=jnp.int32)
    dist0 = jnp.full((B, N), 1e10, dtype=jnp.float32)
    far0 = jnp.zeros((B,), dtype=jnp.int32)
    idxs, _, _ = jax.lax.fori_loop(0, npoint, body, (idxs0, dist0, far0))
    return idxs


def ball_query(radius, nsample, xyz, new_xyz):
    """Returns idx_cnt (B,P) int32 and idx (B,P,nsample) int32."""
    B, N, _ = xyz.shape
    d2 = jnp.sum((new_xyz[:, :, None, :] - xyz[:, None, :, :]) ** 2, axis=-1)  # (B,P,N)
    within = d2 < (radius * radius)
    cnt = jnp.sum(within.astype(jnp.int32), axis=-1)                           # (B,P)
    idx_cnt = jnp.minimum(cnt, nsample)
    arange = jnp.arange(N, dtype=jnp.int32)
    key = jnp.where(within, arange[None, None, :], N)     # invalid -> sentinel N
    order = jnp.sort(key, axis=-1)[:, :, :nsample]        # first valid indices
    first = order[:, :, :1]
    first = jnp.where(first >= N, 0, first)
    idx = jnp.where(order >= N, first, order)             # fill empty slots w/ first
    return idx_cnt, idx


_batched_gather = jax.vmap(lambda pts, idx: pts[idx])      # (N,D), (P,S) -> (P,S,D)


# ----------------------------------------------------------------------------
# Parameter construction: Conv2d(1x1, bias=False) + BatchNorm2d folded together
# ----------------------------------------------------------------------------
def init_mlp_params(key, channels):
    """channels e.g. [Cin, 16, 32]; returns folded (w1, b1, w2, b2), co-major f32."""
    eps = 1e-5
    params = []
    for ci, co in zip(channels[:-1], channels[1:]):
        key, kw, kg, kb = jax.random.split(key, 4)
        w = 0.1 * jax.random.normal(kw, (co, ci), dtype=jnp.float32)   # conv (co, ci, 1, 1)
        gamma = 1.0 + 0.1 * jax.random.normal(kg, (co,), dtype=jnp.float32)
        beta = 0.1 * jax.random.normal(kb, (co,), dtype=jnp.float32)
        running_mean = jnp.zeros((co,), jnp.float32)
        running_var = jnp.ones((co,), jnp.float32)
        scale = gamma / jnp.sqrt(running_var + eps)
        w_fold = (w * scale[:, None]).astype(jnp.float32)              # (co, ci)
        b_fold = (beta - running_mean * scale)[:, None]                # (co, 1)
        params.extend([w_fold, b_fold])
    return tuple(params), key


# ----------------------------------------------------------------------------
# Full SA-module forward (equivalent of _PointnetSAModuleBase.forward)
# ----------------------------------------------------------------------------
def pointnet_sa_forward(xyz, features, mlp_params, npoint, radii, nsamples):
    """xyz: (B,N,3), features: (B,C,N) -> new_xyz (B,npoint,3),
    new_features (B, sum_k mlps[k][-1], npoint)."""
    idx_fps = furthest_point_sample(xyz, npoint)
    new_xyz = _batched_gather(xyz, idx_fps)                            # (B, npoint, 3)
    feats_t = None if features is None else jnp.transpose(features, (0, 2, 1))

    outs = []
    for radius, nsample, params in zip(radii, nsamples, mlp_params):
        idx_cnt, idx = ball_query(radius, nsample, xyz, new_xyz)
        grouped_xyz = _batched_gather(xyz, idx) - new_xyz[:, :, None, :]   # (B,P,S,3)
        if feats_t is not None:
            grouped = jnp.concatenate(
                [grouped_xyz, _batched_gather(feats_t, idx)], axis=-1)     # (B,P,S,3+C)
        else:
            grouped = grouped_xyz
        mask = (idx_cnt > 0).astype(jnp.float32)[:, None, :]               # (B,1,P)
        outs.append(sa_mlp_pool(grouped, mask, *params))                   # (B,Co,P)
    return new_xyz, jnp.concatenate(outs, axis=1)


# Pure-JAX reference of the in-kernel hot path (same bf16 feed) for checking.
def _ref_mlp_pool(grouped, mask, w1, b1, w2, b2):
    x = grouped.astype(jnp.bfloat16).astype(jnp.float32)              # mirror bf16 feed
    w1b = w1.astype(jnp.bfloat16).astype(jnp.float32)
    h = jnp.maximum(jnp.einsum("bpsi,hi->bpsh", x, w1b) + b1[:, 0], 0.0)
    y = jnp.maximum(jnp.einsum("bpsh,oh->bpso", h, w2) + b2[:, 0], 0.0)
    pooled = jnp.max(y, axis=2)                                        # (B,P,Co)
    return jnp.transpose(pooled, (0, 2, 1)) * mask                     # (B,Co,P)


if __name__ == "__main__":
    key = jax.random.PRNGKey(0)
    B, N, C = 2, 1024, 5                # Cin = 3 + C = 8
    npoint = 512
    radii = [0.2, 0.4]
    nsamples = [8, 16]
    mlp_channels = [[3 + C, 16, 32], [3 + C, 16, 32]]

    key, kx, kf = jax.random.split(key, 3)
    xyz = jax.random.uniform(kx, (B, N, 3), dtype=jnp.float32)
    features = jax.random.normal(kf, (B, C, N), dtype=jnp.float32)

    mlp_params = []
    for ch in mlp_channels:
        p, key = init_mlp_params(key, ch)
        mlp_params.append(p)

    new_xyz, new_features = pointnet_sa_forward(
        xyz, features, mlp_params, npoint, radii, nsamples
    )
    jax.block_until_ready((new_xyz, new_features))

    assert new_xyz.shape == (B, npoint, 3)
    assert new_features.shape == (B, sum(ch[-1] for ch in mlp_channels), npoint)

    # Verify kernel against a pure-JAX reference of the MLP+mask+maxpool path.
    idx_fps = furthest_point_sample(xyz, npoint)
    nx = _batched_gather(xyz, idx_fps)
    ft = jnp.transpose(features, (0, 2, 1))
    ref_outs = []
    for radius, nsample, params in zip(radii, nsamples, mlp_params):
        idx_cnt, idx = ball_query(radius, nsample, xyz, nx)
        gx = _batched_gather(xyz, idx) - nx[:, :, None, :]
        gf = _batched_gather(ft, idx)
        grouped = jnp.concatenate([gx, gf], axis=-1)
        mask = (idx_cnt > 0).astype(jnp.float32)[:, None, :]
        ref_outs.append(_ref_mlp_pool(grouped, mask, *params))
    ref = jnp.concatenate(ref_outs, axis=1)
    np.testing.assert_allclose(np.asarray(new_features), np.asarray(ref),
                               rtol=2e-2, atol=2e-2)

    print("KERNEL_OK")
</pallas_src>

<mosaic_0001>
module attributes {stable_mosaic.version = 11 : i64} {
  func.func @kernel(%arg0: i32, %arg1: i32, %arg2: memref<1x8x4096xbf16, #tpu.memory_space<vmem>>, %arg3: memref<1x1x512xf32, #tpu.memory_space<vmem>>, %arg4: memref<16x8xf32, #tpu.memory_space<vmem>>, %arg5: memref<16x1xf32, #tpu.memory_space<vmem>>, %arg6: memref<32x16xf32, #tpu.memory_space<vmem>>, %arg7: memref<32x1xf32, #tpu.memory_space<vmem>>, %arg8: memref<1x32x512xf32, #tpu.memory_space<vmem>>) attributes {dimension_semantics = [#tpu.dimension_semantics<parallel>, #tpu.dimension_semantics<parallel>], iteration_bounds = array<i64: 2, 1>, scalar_prefetch = 0 : i64, scratch_operands = 0 : i64, tpu.core_type = #tpu.core_type<tc>, window_params = [{transform_indices = @transform_0, window_bounds = array<i64: 1, 8, 4096>}, {transform_indices = @transform_1, window_bounds = array<i64: 1, 1, 512>}, {pipeline_mode = #tpu.pipeline_mode<synchronous>, transform_indices = @transform_2, window_bounds = array<i64: 16, 8>}, {pipeline_mode = #tpu.pipeline_mode<synchronous>, transform_indices = @transform_3, window_bounds = array<i64: 16, 1>}, {pipeline_mode = #tpu.pipeline_mode<synchronous>, transform_indices = @transform_4, window_bounds = array<i64: 32, 16>}, {pipeline_mode = #tpu.pipeline_mode<synchronous>, transform_indices = @transform_5, window_bounds = array<i64: 32, 1>}, {transform_indices = @transform_6, window_bounds = array<i64: 1, 32, 512>}]} {
    %c0 = arith.constant 0 : index
    %c0_0 = arith.constant 0 : index
    %c0_1 = arith.constant 0 : index
    %0 = vector.load %arg2[%c0, %c0_0, %c0_1] : memref<1x8x4096xbf16, #tpu.memory_space<vmem>>, vector<1x8x4096xbf16>
    %1 = vector.shape_cast %0 : vector<1x8x4096xbf16> to vector<8x4096xbf16>
    %c0_2 = arith.constant 0 : index
    %c0_3 = arith.constant 0 : index
    %2 = vector.load %arg4[%c0_2, %c0_3] : memref<16x8xf32, #tpu.memory_space<vmem>>, vector<16x8xf32>
    %3 = arith.truncf %2 : vector<16x8xf32> to vector<16x8xbf16>
    %cst = arith.constant dense<0.000000e+00> : vector<16x4096xf32>
    %4 = tpu.matmul %3, %1, %cst {dimension_numbers = #tpu.dot_dimension_numbers<[1], [0], [0], [1], [0, 0, 1, 1], [], []>} : vector<16x8xbf16>, vector<8x4096xbf16>, vector<16x4096xf32> -> vector<16x4096xf32>
    %c0_4 = arith.constant 0 : index
    %c0_5 = arith.constant 0 : index
    %5 = vector.load %arg5[%c0_4, %c0_5] : memref<16x1xf32, #tpu.memory_space<vmem>>, vector<16x1xf32>
    %6 = vector.broadcast %5 : vector<16x1xf32> to vector<16x4096xf32>
    %7 = arith.addf %4, %6 : vector<16x4096xf32>
    %cst_6 = arith.constant 0.000000e+00 : f32
    %8 = vector.broadcast %cst_6 : f32 to vector<16x4096xf32>
    %9 = arith.maximumf %7, %8 : vector<16x4096xf32>
    %c0_7 = arith.constant 0 : index
    %c0_8 = arith.constant 0 : index
    %10 = vector.load %arg6[%c0_7, %c0_8] : memref<32x16xf32, #tpu.memory_space<vmem>>, vector<32x16xf32>
    %cst_9 = arith.constant dense<0.000000e+00> : vector<32x4096xf32>
    %11 = tpu.matmul %10, %9, %cst_9 {dimension_numbers = #tpu.dot_dimension_numbers<[1], [0], [0], [1], [0, 0, 1, 1], [], []>} : vector<32x16xf32>, vector<16x4096xf32>, vector<32x4096xf32> -> vector<32x4096xf32>
    %c0_10 = arith.constant 0 : index
    %c0_11 = arith.constant 0 : index
    %12 = vector.load %arg7[%c0_10, %c0_11] : memref<32x1xf32, #tpu.memory_space<vmem>>, vector<32x1xf32>
    %13 = vector.broadcast %12 : vector<32x1xf32> to vector<32x4096xf32>
    %14 = arith.addf %11, %13 : vector<32x4096xf32>
    %cst_12 = arith.constant 0.000000e+00 : f32
    %15 = vector.broadcast %cst_12 : f32 to vector<32x4096xf32>
    %16 = arith.maximumf %14, %15 : vector<32x4096xf32>
    %17 = vector.extract_strided_slice %16 {offsets = [0, 0], sizes = [32, 512], strides = [1, 1]} : vector<32x4096xf32> to vector<32x512xf32>
    %18 = vector.extract_strided_slice %16 {offsets = [0, 512], sizes = [32, 512], strides = [1, 1]} : vector<32x4096xf32> to vector<32x512xf32>
    %19 = arith.maximumf %17, %18 : vector<32x512xf32>
    %20 = vector.extract_strided_slice %16 {offsets = [0, 1024], sizes = [32, 512], strides = [1, 1]} : vector<32x4096xf32> to vector<32x512xf32>
    %21 = arith.maximumf %19, %20 : vector<32x512xf32>
    %22 = vector.extract_strided_slice %16 {offsets = [0, 1536], sizes = [32, 512], strides = [1, 1]} : vector<32x4096xf32> to vector<32x512xf32>
    %23 = arith.maximumf %21, %22 : vector<32x512xf32>
    %24 = vector.extract_strided_slice %16 {offsets = [0, 2048], sizes = [32, 512], strides = [1, 1]} : vector<32x4096xf32> to vector<32x512xf32>
    %25 = arith.maximumf %23, %24 : vector<32x512xf32>
    %26 = vector.extract_strided_slice %16 {offsets = [0, 2560], sizes = [32, 512], strides = [1, 1]} : vector<32x4096xf32> to vector<32x512xf32>
    %27 = arith.maximumf %25, %26 : vector<32x512xf32>
    %28 = vector.extract_strided_slice %16 {offsets = [0, 3072], sizes = [32, 512], strides = [1, 1]} : vector<32x4096xf32> to vector<32x512xf32>
    %29 = arith.maximumf %27, %28 : vector<32x512xf32>
    %30 = vector.extract_strided_slice %16 {offsets = [0, 3584], sizes = [32, 512], strides = [1, 1]} : vector<32x4096xf32> to vector<32x512xf32>
    %31 = arith.maximumf %29, %30 : vector<32x512xf32>
    %c0_13 = arith.constant 0 : index
    %c0_14 = arith.constant 0 : index
    %c0_15 = arith.constant 0 : index
    %32 = vector.load %arg3[%c0_13, %c0_14, %c0_15] : memref<1x1x512xf32, #tpu.memory_space<vmem>>, vector<1x1x512xf32>
    %33 = vector.shape_cast %32 : vector<1x1x512xf32> to vector<1x512xf32>
    %34 = vector.broadcast %33 : vector<1x512xf32> to vector<32x512xf32>
    %35 = arith.mulf %31, %34 : vector<32x512xf32>
    %c0_16 = arith.constant 0 : index
    %c0_17 = arith.constant 0 : index
    %c0_18 = arith.constant 0 : index
    %36 = vector.load %arg8[%c0_16, %c0_17, %c0_18] : memref<1x32x512xf32, #tpu.memory_space<vmem>>, vector<1x32x512xf32>
    %37 = vector.shape_cast %36 : vector<1x32x512xf32> to vector<32x512xf32>
    %38 = vector.shape_cast %35 : vector<32x512xf32> to vector<1x32x512xf32>
    tpu.vector_store %arg8[%c0_16, %c0_17, %c0_18], %38 {strides = array<i32>} : memref<1x32x512xf32, #tpu.memory_space<vmem>>, vector<1x32x512xf32>,
    return
  }
  func.func @transform_0(%arg0: i32, %arg1: i32) -> (i32, i32, i32) {
    %c0_i32 = arith.constant 0 : i32
    %c0_i32_0 = arith.constant 0 : i32
    return %arg0, %c0_i32, %arg1 : i32, i32, i32
  }
  func.func @transform_1(%arg0: i32, %arg1: i32) -> (i32, i32, i32) {
    %c0_i32 = arith.constant 0 : i32
    %c0_i32_0 = arith.constant 0 : i32
    return %arg0, %c0_i32, %arg1 : i32, i32, i32
  }
  func.func @transform_2(%arg0: i32, %arg1: i32) -> (i32, i32) {
    %c0_i32 = arith.constant 0 : i32
    %c0_i32_0 = arith.constant 0 : i32
    %c0_i32_1 = arith.constant 0 : i32
    return %c0_i32, %c0_i32_0 : i32, i32
  }
  func.func @transform_3(%arg0: i32, %arg1: i32) -> (i32, i32) {
    %c0_i32 = arith.constant 0 : i32
    %c0_i32_0 = arith.constant 0 : i32
    %c0_i32_1 = arith.constant 0 : i32
    return %c0_i32, %c0_i32_0 : i32, i32
  }
  func.func @transform_4(%arg0: i32, %arg1: i32) -> (i32, i32) {
    %c0_i32 = arith.constant 0 : i32
    %c0_i32_0 = arith.constant 0 : i32
    %c0_i32_1 = arith.constant 0 : i32
    return %c0_i32, %c0_i32_0 : i32, i32
  }
  func.func @transform_5(%arg0: i32, %arg1: i32) -> (i32, i32) {
    %c0_i32 = arith.constant 0 : i32
    %c0_i32_0 = arith.constant 0 : i32
    %c0_i32_1 = arith.constant 0 : i32
    return %c0_i32, %c0_i32_0 : i32, i32
  }
  func.func @transform_6(%arg0: i32, %arg1: i32) -> (i32, i32, i32) {
    %c0_i32 = arith.constant 0 : i32
    %c0_i32_0 = arith.constant 0 : i32
    return %arg0, %c0_i32, %arg1 : i32, i32, i32
  }
}

</mosaic_0001>

<bundles_post_ra>
// kernel: tpu_custom_call.1
= control target key start
LH: loop header
LB: loop body
LE: loop exit
PB: predicated region body
PF: predicated region fallthrough
CT: control target
= control target key end

     0   :  { %11 = vsyncpa [#allocation3], 0  ;;  %s4737_s0 = inlined_call_operand.hbm [shape: bf16[2,8,4096], index: 0, kind: input, shape index: {}]   ;;  %s4738_s1 = inlined_call_operand.vmem [shape: f32[2,1,512], index: 1, kind: input, shape index: {}]   ;;  %s4739_s2 = inlined_call_operand.vmem [shape: f32[16,8], index: 2, kind: input, shape index: {}]   ;;  %s4740_s3 = inlined_call_operand.vmem [shape: f32[16,1], index: 3, kind: input, shape index: {}]   ;;  %s4741_s4 = inlined_call_operand.vmem [shape: f32[32,16], index: 4, kind: input, shape index: {}]   ;;  %s4742_s5 = inlined_call_operand.vmem [shape: f32[32,1], index: 5, kind: input, shape index: {}]   ;;  %s4743_s6 = inlined_call_operand.hbm [shape: f32[2,32,512], index: 6, kind: output, shape index: {}]  }
   0x1   :  { %13 = vsyncpa [#allocation3 + $0x1], 0 }
   0x2   :  { %14 = vsyncpa [#allocation4], 0 }
   0x3   :  { %16 = vsyncpa [#allocation4 + $0x1], 0  ;;  %s3628_s21 = smov 0   ;;  %s3630_s22 = smov 0  }
   0x4   :  { %s3632_s23 = smov 0   ;;  %s3634_s24 = smov 0  }
   0x5   :  { %s3636_s25 = smov 0   ;;  %s3638_s26 = smov 0  }
   0x6 LB: > { %s3163_s27 = sadd.s32 4294967295, %s3585_s26   ;;  %s3164_s28 = sadd.s32 4294967294, %s3585_s26   ;;  %s3585_s26 = sphi %s3638_s26, %s22_s26   ;;  %s3581_s25 = sphi %s3636_s25, %s4759_s25   ;;  %s3577_s24 = sphi %s3634_s24, %s4758_s24   ;;  %s3573_s23 = sphi %s3632_s23, %s4757_s23   ;;  %s3569_s22 = sphi %s3630_s22, %s4756_s22   ;;  %s3565_s21 = sphi %s3628_s21, %s4755_s21  }
   0x7   : > { %s34_s29 = sadd.s32 1, %s3581_s25  ;;  %s43_s30 = sadd.s32 1, %s3573_s23 }
   0x8   : > { %p36_p0 = scmp.ge.s32.totalorder %s34_s29, 2  ;;  %p50_p1 = scmp.ne.s32.totalorder %s3573_s23, %s3569_s22 }
   0x9   : > { %p51_p2 = scmp.eq.s32.totalorder %s3585_s26, 0  ;;  %p56_p3 = scmp.ne.s32.totalorder %s3569_s22, %s3565_s21 }
   0xa   : > { %s4761_s29 = smov (%p36_p0, %s34_s29), 0  ;;  %p57_p5 = scmp.eq.s32.totalorder %s3163_s27, 0 }
   0xb   : > { %p3669_p4 = por %p51_p2, %p50_p1  ;;  %s38_s8 = ssub.s32 %s3581_s25, %s4761_s29 }
   0xc   : > { %p194_p6 = scmp.eq.s32.totalorder %s3163_s27, 1  ;;  %p41_p7 = scmp.eq.s32.totalorder %s38_s8, 0 }
   0xd   : > { %p3675_p8 = por %p57_p5, %p56_p3  ;;  %p200_p10 = scmp.eq.s32.totalorder %s3164_s28, 1 }
   0xe   : > { %p3679_p9 = por %p194_p6, %p50_p1  ;;  %p3385_p13 = scmp.lt.s32.totalorder %s3585_s26, 2 }
   0xf   : > { %s3684_s11 = scalar_select %p41_p7, %s3573_s23, %s43_s30  }
  0x10   : > { %s4747_s10 = scalar_select %p3679_p9, 1, 0 }
  0x11   : > { %p3686_p11 = por %p200_p10, %p56_p3  ;;  %s232_s13 = sand.u32 1, %s3573_s23  }
  0x12   : > { %s3167_s14 = sshll.u32 %s232_s13, 7  ;;  %s3307_s15 = sshll.u32 %s3581_s25, 11 }
  0x13   : > { %s4748_s12 = scalar_select %p3686_p11, 1, 0 }
  0x14   : > { %s3697_s18 = scalar_lea.hbm %s4737_s0, %s3307_s15  ;;  %s236_s19 = scalar_lea.vmem [#allocation2], %s3167_s14 }
  0x15   : > { %s246_s20 = sshll.u32 %s236_s19, 4  ;;  %p3703_p0 = pnand %p3385_p13, %p3669_p4  ;;  %s3699_s20 = int_to_ptr.vmem [resolvable:$true] %s246_s20 }
  0x16   : > { %s233_s28 = scalar_lea.sflag [#allocation3], %s232_s13  ;;  %s3473_s30 = scalar_lea.hbm %s3697_s18, 2048 }
  0x17   : > { %p3474_p3 = scmp.ne.s32.totalorder %s3697_s18, %s3473_s30  ;;  %p3475_p5 = pneg %p3703_p0 }
  0x18   : > { %s3478_s7 = scalar_lea.hbm %s4737_s0, 4096  ;;  %p3479_p4 = scmp.lt.u32.totalorder %s3697_s18, %s4737_s0 }
  0x19   : > { %p3476_p6 = pnand %p3475_p5, %p3474_p3  ;;  %p3480_p10 = scmp.lt.u32.totalorder %s3478_s7, %s3473_s30 }
  0x1a   : > { %p3482_p12 = scmp.lt.u32.totalorder %s3473_s30, %s3697_s18 }
  0x1b   : > { %p3477_p7 = pneg %p3476_p6  ;;  %p3481_p13 = por %p3480_p10, %p3479_p4 }
  0x1d   : > { %p3483_p1 = por %p3482_p12, %p3481_p13 }
  0x1f   : > { %p3484_p2 = pnand %p3483_p1, %p3477_p7 }
  0x21   : > { %3487 = shalt.err (!%p3484_p2)
}
  0x22   : > { %s3488_s13 = scalar_lea.vmem %s3699_s20, 2048  ;;  %s3587_s17 = smov [#allocation2]  }
  0x23   : > { %p3489_p3 = scmp.ne.s32.totalorder %s3699_s20, %s3488_s13  ;;  %s3493_s19 = sshll.u32 %s3587_s17, 4  ;;  %s3494_s19 = int_to_ptr.vmem [resolvable:$false] %s3493_s19 }
  0x24   : > { %s3495_s8 = scalar_lea.vmem %s3494_s19, 4096  ;;  %p3496_p9 = scmp.lt.s32.totalorder %s3699_s20, %s3494_s19 }
  0x25   : > { %p3491_p6 = pnand %p3489_p3, %p3475_p5  ;;  %p3497_p4 = scmp.lt.s32.totalorder %s3495_s8, %s3488_s13 }
  0x27   : > { %p3492_p11 = pneg %p3491_p6  ;;  %p3498_p10 = por %p3497_p4, %p3496_p9 }
  0x29   : > { %p3499_p12 = pnand %p3498_p10, %p3492_p11 }
  0x2b   : > { %3502 = shalt.err (!%p3499_p12)
}
  0x2c   : > { %3380 = dma.hbm_to_vmem [thread:$0]  (!%p3703_p0), %s3697_s18, 2048, %s3699_s20, %s233_s28  }
  0x2d   : > { %p4750_p1 = scmp.lt.s32.totalorder %s3585_s26, 3  ;;  %p4751_p2 = scmp.ge.s32.totalorder %s3585_s26, 1 }
  0x2f   : > { %p264_p5 = pnand %p4751_p2, %p4750_p1 }
  0x30   : > { %s3739_s30 = sand.u32 (!%p264_p5), 1, %s3569_s22  }
  0x31   : > { %267 = sbr.rel (%p264_p5) target bundleno = 650 (0x28a), region = 44  ;;  %s3171_s14 = sshll.u32 (!%p264_p5), %s3739_s30, 7 }
  0x32   : > { %s270_s7 = scalar_lea.sflag (!%p264_p5), [#allocation3], %s3739_s30  ;;  %s3745_s27 = scalar_lea.vmem (!%p264_p5), [#allocation2], %s3171_s14 }
  0x38   : > { %3556 = dma.done.wait (%p3675_p8), %s270_s7, 2048  }
  0x39   : > { %3558 = vsyncadd (%p3675_p8), %s270_s7, 4294965248  ;;  %v3588_v0 = vmov 0   ;;  %v322_v1 = vld [vmem:[%s3745_s27] sm:$0xff]  ;;  %vm437_vm0 = vcmask 1043456   ;;  %v323_v2 = vld [vmem:[%s3745_s27 + $0x8] sm:$0xff]  ;;  %vm433_vm1 = vcmask 64512  }
  0x3a   : > { %566 = vmatprep.mubr.bf16.mxu0 %v3588_v0  ;;  %609 = vmatprep.mubr.bf16.mxu1 %v3588_v0  ;;  %v338_v3 = vld [vmem:[%s4739_s2] sm:$0xff]  ;;  %v3175_v4 = vcombine.high %v322_v1, %v322_v1  ;;  %v3177_v5 = vcombine.high %v323_v2, %v323_v2  ;;  %v3174_v6 = vcombine.low %v322_v1, %v322_v1  ;;  %v339_v8 = vld [vmem:[%s4739_s2 + $0x8] sm:$0xff]  ;;  %v324_v9 = vld [vmem:[%s3745_s27 + $0x10] sm:$0xff]  ;;  %vm1314_vm2 = vcmask 130048   ;;  %p312_p8 = scmp.lt.s32.totalorder %s3577_s24, 1  ;;  %s4631_s16 = scalar_lea.vmem [#allocation5], %s3171_s14 }
  0x3b   : > { %3439 = vset.pattern.permute.xlu0 %v3588_v0  ;;  %3440 = vset.pattern.permute.xlu1 %v3588_v0  ;;  %v3176_v7 = vcombine.low %v323_v2, %v323_v2  ;;  %v325_v10 = vld [vmem:[%s3745_s27 + $0x18] sm:$0xff]  ;;  %v3179_v11 = vcombine.high %v324_v9, %v324_v9  ;;  %v3178_v13 = vcombine.low %v324_v9, %v324_v9  ;;  %v326_v18 = vld [vmem:[%s3745_s27 + $0x20] sm:$0xff]  ;;  %v327_v19 = vld [vmem:[%s3745_s27 + $0x28] sm:$0xff]  ;;  %s3308_s14 = sshll.u32 %s3577_s24, 11  ;;  %s3061_s13 = sshll.u32 %s4631_s16, 4  ;;  %s4682_s13 = int_to_ptr.vmem [resolvable:$true] %s3061_s13 }
  0x3c   : > { %v3181_v12 = vcombine.high %v325_v10, %v325_v10  ;;  %3206 = vmatprep.subr.msk.bf16.mxu0 %vm437_vm0, %v3175_v4  ;;  %3208 = vmatprep.subr.msk.bf16.mxu1 %vm437_vm0, %v3177_v5  ;;  %v439_v14 = vsel %vm437_vm0, %v3174_v6, 0  ;;  %v3769_v16 = vpack.c.bf16 %v339_v8, %v338_v3  ;;  %v3180_v17 = vcombine.low %v325_v10, %v325_v10  ;;  %v341_v24 = vld [vmem:[%s4740_s3] sm:$0xff]  ;;  %v328_v27 = vld [vmem:[%s3745_s27 + $0x30] sm:$0xff]  ;;  %v329_v28 = vld [vmem:[%s3745_s27 + $0x38] sm:$0xff]  ;;  %s4547_s18 = scalar_select %p312_p8, %s3577_s24, 1 }
  0x3d   : > { %v445_v15 = vsel %vm437_vm0, %v3176_v7, 0  ;;  %535 = vmatpush1.bf16.msra.mxu0 %v439_v14  ;;  %v451_v20 = vsel %vm437_vm0, %v3178_v13, 0  ;;  %v3183_v22 = vcombine.high %v326_v18, %v326_v18  ;;  %v3185_v23 = vcombine.high %v327_v19, %v327_v19  ;;  %345 = vperm.xlu0 %3439, %v341_v24   ;;  %v342_v33 = vld [vmem:[%s4740_s3 + $0x8] sm:$0xff]  ;;  %v330_v36 = vld [vmem:[%s3745_s27 + $0x40] sm:$0xff]  ;;  %v1292_v42 = vld [vmem:[%s4742_s5 + $0x10] sm:$0xff]  ;;  %s4680_s19 = scalar_lea.hbm %s4743_s6, %s3308_s14  ;;  %s3046_s8 = scalar_lea.sflag [#allocation4], %s3739_s30 }
  0x3e   : > { %578 = vmatpush1.bf16.msra.mxu1 %v445_v15  ;;  %3210 = vmatprep.subr.msk.bf16.mxu0 %vm437_vm0, %v3179_v11  ;;  %v457_v21 = vsel %vm437_vm0, %v3180_v17, 0  ;;  %v3182_v25 = vcombine.low %v326_v18, %v326_v18  ;;  %v3184_v26 = vcombine.low %v327_v19, %v327_v19  ;;  %v3187_v31 = vcombine.high %v328_v27, %v328_v27  ;;  %v331_v37 = vld [vmem:[%s3745_s27 + $0x48] sm:$0xff]  ;;  %v332_v45 = vld [vmem:[%s3745_s27 + $0x50] sm:$0xff]  ;;  %v333_v46 = vld [vmem:[%s3745_s27 + $0x58] sm:$0xff]  ;;  %s3173_s20 = sshll.u32 %s4547_s18, 2  ;;  %s3503_s7 = scalar_lea.vmem %s4682_s13, 2048 }
  0x3f   : > { %3212 = vmatprep.subr.msk.bf16.mxu1 %vm437_vm0, %v3181_v12  ;;  %v3189_v32 = vcombine.high %v329_v28, %v329_v28  ;;  %v3186_v34 = vcombine.low %v328_v27, %v328_v27  ;;  %v3188_v35 = vcombine.low %v329_v28, %v329_v28  ;;  %v3191_v40 = vcombine.high %v330_v36, %v330_v36  ;;  %v334_v53 = vld [vmem:[%s3745_s27 + $0x60] sm:$0xff]  ;;  %v335_v54 = vld [vmem:[%s3745_s27 + $0x68] sm:$0xff]  ;;  %v336_v61 = vld [vmem:[%s3745_s27 + $0x70] sm:$0xff]  ;;  %s318_s15 = scalar_lea.vmem %s4738_s1, %s3173_s20  ;;  %p3504_p9 = scmp.ne.s32.totalorder %s4682_s13, %s3503_s7 }
  0x40   : > { %3207 = vmatmul.mubr.msk.bf16.vlgmr.msra.gmra.mrb[0].mxu0 %vm433_vm1, %v3769_v16  ;;  %v463_v29 = vsel %vm437_vm0, %v3182_v25, 0  ;;  %v469_v30 = vsel %vm437_vm0, %v3184_v26, 0  ;;  %v3193_v41 = vcombine.high %v331_v37, %v331_v37  ;;  %v3190_v43 = vcombine.low %v330_v36, %v330_v36  ;;  %v337_v62 = vld [vmem:[%s3745_s27 + $0x78] sm:$0xff]  ;;  %v1290_v9 = vld [vmem:[%s4742_s5] sm:$0xff]  ;;  %p4752_p11 = scmp.ne.s32.totalorder %s4747_s10, 0  ;;  %s3590_s27 = smov [#allocation5]  }
  0x41   : > { %3209 = vmatmul.mubr.msk.bf16.vlgmr.msra.gmra.mrb[0].mxu1 %vm433_vm1, %v3769_v16  ;;  %621 = vmatpush1.bf16.msra.mxu0 %v451_v20  ;;  %v475_v38 = vsel %vm437_vm0, %v3186_v34, 0  ;;  %v481_v39 = vsel %vm437_vm0, %v3188_v35, 0  ;;  %v3192_v44 = vcombine.low %v331_v37, %v331_v37  ;;  %v3195_v49 = vcombine.high %v332_v45, %v332_v45  ;;  %v1293_v10 = vld [vmem:[%s4742_s5 + $0x18] sm:$0xff]  ;;  %s3507_s18 = sshll.u32 %s3590_s27, 4  ;;  %s3508_s18 = int_to_ptr.vmem [resolvable:$false] %s3507_s18 }
  0x42   : > { %664 = vmatpush1.bf16.msra.mxu1 %v457_v21  ;;  %652 = vmatprep.mubr.bf16.mxu0 %v3588_v0  ;;  %v487_v47 = vsel %vm437_vm0, %v3190_v43, 0  ;;  %v3197_v50 = vcombine.high %v333_v46, %v333_v46  ;;  %v3194_v51 = vcombine.low %v332_v45, %v332_v45  ;;  %v3196_v52 = vcombine.low %v333_v46, %v333_v46  ;;  %p3505_p0 = pnand %p3504_p9, %p4752_p11  ;;  %s3509_s20 = scalar_lea.vmem %s3508_s18, 4096 }
  0x43   : > { %695 = vmatprep.mubr.bf16.mxu1 %v3588_v0  ;;  %3214 = vmatprep.subr.msk.bf16.mxu0 %vm437_vm0, %v3183_v22  ;;  %v493_v48 = vsel %vm437_vm0, %v3192_v44, 0  ;;  %v3199_v57 = vcombine.high %v334_v53, %v334_v53  ;;  %v3201_v58 = vcombine.high %v335_v54, %v335_v54  ;;  %v3198_v59 = vcombine.low %v334_v53, %v334_v53  ;;  %p3510_p13 = scmp.lt.s32.totalorder %s4682_s13, %s3508_s18  ;;  %p3511_p3 = scmp.lt.s32.totalorder %s3509_s20, %s3503_s7 }
  0x44   : > { %3216 = vmatprep.subr.msk.bf16.mxu1 %vm437_vm0, %v3185_v23  ;;  %350 = vperm.xlu0 %3439, %v342_v33   ;;  %v499_v55 = vsel %vm437_vm0, %v3194_v51, 0  ;;  %v505_v56 = vsel %vm437_vm0, %v3196_v52, 0  ;;  %v3200_v60 = vcombine.low %v335_v54, %v335_v54  ;;  %v3203_v2 = vcombine.high %v336_v61, %v336_v61  ;;  %p3506_p7 = pneg %p3505_p0 }
  0x45   : > { %v511_v63 = vsel %vm437_vm0, %v3198_v59, 0  ;;  %v3205_v3 = vcombine.high %v337_v62, %v337_v62  ;;  %v3202_v4 = vcombine.low %v336_v61, %v336_v61  ;;  %v3204_v5 = vcombine.low %v337_v62, %v337_v62  ;;  %1296 = vperm.xlu1 %3440, %v1290_v9   ;;  %p3512_p6 = por %p3511_p3, %p3510_p13 }
  0x46   : > { %v517_v1 = vsel %vm437_vm0, %v3200_v60, 0  ;;  %v3589_v8 = vmov 0.0  }
  0x47   : > { %v523_v6 = vsel %vm437_vm0, %v3202_v4, 0  ;;  %v529_v7 = vsel %vm437_vm0, %v3204_v5, 0  ;;  %v3911_v5 = vld [vmem:[%s4741_s4 + $0x8] sm:$0xff]  ;;  %p3513_p4 = pnand %p3512_p6, %p3506_p7 }
  0x48   : > { %3211 = vmatmul.mubr.msk.bf16.vlgmr.msra.gmra.mrb[4].mxu0 %vm433_vm1, %v3769_v16  ;;  %1306 = vperm.xlu0 %3439, %v1292_v42  }
  0x49   : > { %3213 = vmatmul.mubr.msk.bf16.vlgmr.msra.gmra.mrb[4].mxu1 %vm433_vm1, %v3769_v16  ;;  %707 = vmatpush1.bf16.msra.mxu0 %v463_v29 }
  0x4a   : > { %750 = vmatpush1.bf16.msra.mxu1 %v469_v30  ;;  %738 = vmatprep.mubr.bf16.mxu0 %v3588_v0 }
  0x4b   : > { %781 = vmatprep.mubr.bf16.mxu1 %v3588_v0  ;;  %3218 = vmatprep.subr.msk.bf16.mxu0 %vm437_vm0, %v3187_v31 }
  0x4c   : > { %3220 = vmatprep.subr.msk.bf16.mxu1 %vm437_vm0, %v3189_v32 }
  0x50   : > { %3215 = vmatmul.mubr.msk.bf16.vlgmr.msra.gmra.mrb[8].mxu0 %vm433_vm1, %v3769_v16 }
  0x51   : > { %3217 = vmatmul.mubr.msk.bf16.vlgmr.msra.gmra.mrb[8].mxu1 %vm433_vm1, %v3769_v16  ;;  %793 = vmatpush1.bf16.msra.mxu0 %v475_v38 }
  0x52   : > { %836 = vmatpush1.bf16.msra.mxu1 %v481_v39  ;;  %824 = vmatprep.mubr.bf16.mxu0 %v3588_v0 }
  0x53   : > { %867 = vmatprep.mubr.bf16.mxu1 %v3588_v0  ;;  %3222 = vmatprep.subr.msk.bf16.mxu0 %vm437_vm0, %v3191_v40 }
  0x54   : > { %3224 = vmatprep.subr.msk.bf16.mxu1 %vm437_vm0, %v3193_v41 }
  0x58   : > { %3219 = vmatmul.mubr.msk.bf16.vlgmr.msra.gmra.mrb[12].mxu0 %vm433_vm1, %v3769_v16 }
  0x59   : > { %3221 = vmatmul.mubr.msk.bf16.vlgmr.msra.gmra.mrb[12].mxu1 %vm433_vm1, %v3769_v16  ;;  %879 = vmatpush1.bf16.msra.mxu0 %v487_v47 }
  0x5a   : > { %922 = vmatpush1.bf16.msra.mxu1 %v493_v48  ;;  %910 = vmatprep.mubr.bf16.mxu0 %v3588_v0 }
  0x5b   : > { %953 = vmatprep.mubr.bf16.mxu1 %v3588_v0  ;;  %3226 = vmatprep.subr.msk.bf16.mxu0 %vm437_vm0, %v3195_v49 }
  0x5c   : > { %3228 = vmatprep.subr.msk.bf16.mxu1 %vm437_vm0, %v3197_v50 }
  0x60   : > { %3223 = vmatmul.mubr.msk.bf16.vlgmr.msra.gmra.mrb[16].mxu0 %vm433_vm1, %v3769_v16 }
  0x61   : > { %3225 = vmatmul.mubr.msk.bf16.vlgmr.msra.gmra.mrb[16].mxu1 %vm433_vm1, %v3769_v16  ;;  %965 = vmatpush1.bf16.msra.mxu0 %v499_v55  ;;  %v3898_v55 = vld [vmem:[%s4741_s4] sm:$0xff] }
  0x62   : > { %1008 = vmatpush1.bf16.msra.mxu1 %v505_v56  ;;  %996 = vmatprep.mubr.bf16.mxu0 %v3588_v0 }
  0x63   : > { %1039 = vmatprep.mubr.bf16.mxu1 %v3588_v0  ;;  %3230 = vmatprep.subr.msk.bf16.mxu0 %vm437_vm0, %v3199_v57 }
  0x64   : > { %3232 = vmatprep.subr.msk.bf16.mxu1 %vm437_vm0, %v3201_v58 }
  0x68   : > { %3227 = vmatmul.mubr.msk.bf16.vlgmr.msra.gmra.mrb[20].mxu0 %vm433_vm1, %v3769_v16 }
  0x69   : > { %3229 = vmatmul.mubr.msk.bf16.vlgmr.msra.gmra.mrb[20].mxu1 %vm433_vm1, %v3769_v16  ;;  %1051 = vmatpush1.bf16.msra.mxu0 %v511_v63 }
  0x6a   : > { %1094 = vmatpush1.bf16.msra.mxu1 %v517_v1  ;;  %1082 = vmatprep.mubr.bf16.mxu0 %v3588_v0 }
  0x6b   : > { %1125 = vmatprep.mubr.bf16.mxu1 %v3588_v0  ;;  %3234 = vmatprep.subr.msk.bf16.mxu0 %vm437_vm0, %v3203_v2 }
  0x6c   : > { %3236 = vmatprep.subr.msk.bf16.mxu1 %vm437_vm0, %v3205_v3 }
  0x70   : > { %3231 = vmatmul.mubr.msk.bf16.vlgmr.msra.gmra.mrb[24].mxu0 %vm433_vm1, %v3769_v16 }
  0x71   : > { %3233 = vmatmul.mubr.msk.bf16.vlgmr.msra.gmra.mrb[24].mxu1 %vm433_vm1, %v3769_v16  ;;  %1137 = vmatpush1.bf16.msra.mxu0 %v523_v6 }
  0x72   : > { %1180 = vmatpush1.bf16.msra.mxu1 %v529_v7  ;;  %1168 = vmatprep.mubr.bf16.mxu0 %v3588_v0 }
  0x73   : > { %1211 = vmatprep.mubr.bf16.mxu1 %v3588_v0  ;;  %v1291_v0 = vld [vmem:[%s4742_s5 + $0x8] sm:$0xff] }
  0x74   : > { %1301 = vperm.xlu1 %3440, %v1291_v0  }
  0x78   : > { %3235 = vmatmul.mubr.msk.bf16.vlgmr.msra.gmra.mrb[28].mxu0 %vm433_vm1, %v3769_v16  ;;  %1311 = vperm.xlu1 %3440, %v1293_v10  }
  0x79   : > { %3237 = vmatmul.mubr.msk.bf16.vlgmr.msra.gmra.mrb[28].mxu1 %vm433_vm1, %v3769_v16  ;;  %1391 = vmatprep.mubr.f32.mxu0 %v3589_v8 }
  0x7a   : > { %1480 = vmatprep.mubr.f32.mxu1 %v3589_v8 }
  0xbc   : > { %v3877_v11 = vpop.permute.xlu0 %345 }
  0xc3   : > { %v3879_v12 = vpop.permute.xlu0 %350 }
 0x113   : > { %v568_v13 = vpop.f32.mrb[0].mxu0 }
 0x114   : > { %v611_v14 = vpop.f32.mrb[0].mxu1  ;;  %v569_v15 = vadd.f32 %v568_v13, %v3877_v11  ;;  %v570_v17 = vpop.f32.mrb[1].mxu0 }
 0x115   : > { %v612_v16 = vadd.f32 %v611_v14, %v3877_v11  ;;  %v613_v18 = vpop.f32.mrb[1].mxu1  ;;  %v571_v19 = vadd.f32 %v570_v17, %v3877_v11  ;;  %v572_v21 = vpop.f32.mrb[2].mxu0 }
 0x116   : > { %v614_v20 = vadd.f32 %v613_v18, %v3877_v11  ;;  %v615_v22 = vpop.f32.mrb[2].mxu1  ;;  %v573_v23 = vadd.f32 %v572_v21, %v3879_v12  ;;  %v574_v25 = vpop.f32.mrb[3].mxu0  ;;  %v1222_v29 = vmax.f32 %v569_v15, 0.0 }
 0x117   : > { %v616_v24 = vadd.f32 %v615_v22, %v3879_v12  ;;  %v617_v26 = vpop.f32.mrb[3].mxu1  ;;  %v575_v27 = vadd.f32 %v574_v25, %v3879_v12  ;;  %v1224_v30 = vmax.f32 %v612_v16, 0.0  ;;  %v1223_v33 = vmax.f32 %v571_v19, 0.0 }
 0x118   : > { %v618_v28 = vadd.f32 %v617_v26, %v3879_v12  ;;  %v1254_v31 = vmax.f32 %v573_v23, 0.0  ;;  %v1225_v34 = vmax.f32 %v614_v20, 0.0 }
 0x119   : > { %v1256_v32 = vmax.f32 %v616_v24, 0.0  ;;  %v1255_v35 = vmax.f32 %v575_v27, 0.0  ;;  %v3926_v24 = vld [vmem:[%s4741_s4 + $0x10] sm:$0xff] }
 0x11a   : > { %v1257_v36 = vmax.f32 %v618_v28, 0.0  ;;  %v3311_v37 = vpack.c.bf16 %v1254_v31, %v1222_v29 }
 0x11b   : > { %v3315_v38 = vpack.c.bf16 %v1256_v32, %v1224_v30  ;;  %v3309_v39 = vpack.c.bf16 %v1255_v35, %v1223_v33  ;;  %v654_v41 = vpop.f32.mrb[4].mxu0 }
 0x11c   : > { %v3313_v40 = vpack.c.bf16 %v1257_v36, %v1225_v34  ;;  %v697_v42 = vpop.f32.mrb[4].mxu1  ;;  %v655_v43 = vadd.f32 %v654_v41, %v3877_v11  ;;  %v656_v45 = vpop.f32.mrb[5].mxu0 }
 0x11d   : > { %v698_v44 = vadd.f32 %v697_v42, %v3877_v11  ;;  %v699_v46 = vpop.f32.mrb[5].mxu1  ;;  %v657_v47 = vadd.f32 %v656_v45, %v3877_v11  ;;  %v658_v49 = vpop.f32.mrb[6].mxu0  ;;  %3310 = vmatprep.subr.bf16.mxu0 %v3309_v39 }
 0x11e   : > { %v700_v48 = vadd.f32 %v699_v46, %v3877_v11  ;;  %v701_v50 = vpop.f32.mrb[6].mxu1  ;;  %3314 = vmatprep.subr.bf16.mxu1 %v3313_v40  ;;  %v659_v51 = vadd.f32 %v658_v49, %v3879_v12  ;;  %v660_v53 = vpop.f32.mrb[7].mxu0  ;;  %3312 = vmatpush1.bf16.msra.mxu0 %v3311_v37  ;;  %v1226_v58 = vmax.f32 %v655_v43, 0.0  ;;  %v3941_v37 = vld [vmem:[%s4741_s4 + $0x18] sm:$0xff] }
 0x11f   : > { %v702_v52 = vadd.f32 %v701_v50, %v3879_v12  ;;  %v703_v54 = vpop.f32.mrb[7].mxu1  ;;  %3316 = vmatpush1.bf16.msra.mxu1 %v3315_v38  ;;  %v661_v56 = vadd.f32 %v660_v53, %v3879_v12  ;;  %v1228_v59 = vmax.f32 %v698_v44, 0.0  ;;  %v1227_v62 = vmax.f32 %v657_v47, 0.0 }
 0x120   : > { %v704_v57 = vadd.f32 %v703_v54, %v3879_v12  ;;  %v1258_v60 = vmax.f32 %v659_v51, 0.0  ;;  %v1229_v63 = vmax.f32 %v700_v48, 0.0 }
 0x121   : > { %v1260_v61 = vmax.f32 %v702_v52, 0.0  ;;  %v1259_v1 = vmax.f32 %v661_v56, 0.0  ;;  %3238 = vmatmul.mubr.msk.f32.vlgmr.msra.gmra.mrb[32].mxu0 %vm1314_vm2, %v3898_v55 }
 0x122   : > { %v1261_v2 = vmax.f32 %v704_v57, 0.0  ;;  %3242 = vmatmul.mubr.msk.f32.vlgmr.msra.gmra.mrb[32].mxu1 %vm1314_vm2, %v3898_v55  ;;  %v3319_v3 = vpack.c.bf16 %v1258_v60, %v1226_v58  ;;  %1397 = vmatprep.mubr.f32.mxu0 %v3589_v8 }
 0x123   : > { %v3323_v4 = vpack.c.bf16 %v1260_v61, %v1228_v59  ;;  %1486 = vmatprep.mubr.f32.mxu1 %v3589_v8  ;;  %v3317_v6 = vpack.c.bf16 %v1259_v1, %v1227_v62  ;;  %v740_v9 = vpop.f32.mrb[8].mxu0 }
 0x124   : > { %v3321_v7 = vpack.c.bf16 %v1261_v2, %v1229_v63  ;;  %v783_v0 = vpop.f32.mrb[8].mxu1  ;;  %v741_v10 = vadd.f32 %v740_v9, %v3877_v11  ;;  %v742_v14 = vpop.f32.mrb[9].mxu0 }
 0x125   : > { %v784_v13 = vadd.f32 %v783_v0, %v3877_v11  ;;  %v785_v15 = vpop.f32.mrb[9].mxu1  ;;  %v743_v16 = vadd.f32 %v742_v14, %v3877_v11  ;;  %v744_v18 = vpop.f32.mrb[10].mxu0  ;;  %3239 = vmatmul.mubr.msk.f32.gmra.mrb[34].mxu0 %vm1314_vm2, %v3911_v5  ;;  %3318 = vmatprep.subr.bf16.mxu0 %v3317_v6 }
 0x126   : > { %v786_v17 = vadd.f32 %v785_v15, %v3877_v11  ;;  %v787_v19 = vpop.f32.mrb[10].mxu1  ;;  %3243 = vmatmul.mubr.msk.f32.gmra.mrb[34].mxu1 %vm1314_vm2, %v3911_v5  ;;  %v745_v20 = vadd.f32 %v744_v18, %v3879_v12  ;;  %3322 = vmatprep.subr.bf16.mxu1 %v3321_v7  ;;  %v746_v22 = vpop.f32.mrb[11].mxu0  ;;  %v1230_v27 = vmax.f32 %v741_v10, 0.0 }
 0x127   : > { %v788_v21 = vadd.f32 %v787_v19, %v3879_v12  ;;  %v789_v23 = vpop.f32.mrb[11].mxu1  ;;  %v747_v25 = vadd.f32 %v746_v22, %v3879_v12  ;;  %3320 = vmatpush1.bf16.msra.mxu0 %v3319_v3  ;;  %3324 = vmatpush1.bf16.msra.mxu1 %v3323_v4  ;;  %v1232_v28 = vmax.f32 %v784_v13, 0.0  ;;  %v1231_v31 = vmax.f32 %v743_v16, 0.0 }
 0x128   : > { %v790_v26 = vadd.f32 %v789_v23, %v3879_v12  ;;  %v1262_v29 = vmax.f32 %v745_v20, 0.0  ;;  %1403 = vmatprep.mubr.f32.mxu0 %v3589_v8  ;;  %1492 = vmatprep.mubr.f32.mxu1 %v3589_v8  ;;  %v1233_v32 = vmax.f32 %v786_v17, 0.0 }
 0x129   : > { %v1264_v30 = vmax.f32 %v788_v21, 0.0  ;;  %v1263_v33 = vmax.f32 %v747_v25, 0.0  ;;  %3240 = vmatmul.mubr.msk.f32.gmra.mrb[36].mxu0 %vm1314_vm2, %v3926_v24 }
 0x12a   : > { %v1265_v34 = vmax.f32 %v790_v26, 0.0  ;;  %3244 = vmatmul.mubr.msk.f32.gmra.mrb[36].mxu1 %vm1314_vm2, %v3926_v24  ;;  %v3327_v35 = vpack.c.bf16 %v1262_v29, %v1230_v27  ;;  %1409 = vmatprep.mubr.f32.mxu0 %v3589_v8 }
 0x12b   : > { %v3331_v36 = vpack.c.bf16 %v1264_v30, %v1232_v28  ;;  %1498 = vmatprep.mubr.f32.mxu1 %v3589_v8  ;;  %v3325_v38 = vpack.c.bf16 %v1263_v33, %v1231_v31  ;;  %v826_v40 = vpop.f32.mrb[12].mxu0 }
 0x12c   : > { %v3329_v39 = vpack.c.bf16 %v1265_v34, %v1233_v32  ;;  %v869_v41 = vpop.f32.mrb[12].mxu1  ;;  %v827_v42 = vadd.f32 %v826_v40, %v3877_v11  ;;  %v828_v44 = vpop.f32.mrb[13].mxu0 }
 0x12d   : > { %v870_v43 = vadd.f32 %v869_v41, %v3877_v11  ;;  %v871_v45 = vpop.f32.mrb[13].mxu1  ;;  %v829_v46 = vadd.f32 %v828_v44, %v3877_v11  ;;  %v830_v48 = vpop.f32.mrb[14].mxu0  ;;  %3241 = vmatmul.mubr.msk.f32.gmra.mrb[38].mxu0 %vm1314_vm2, %v3941_v37  ;;  %3326 = vmatprep.subr.bf16.mxu0 %v3325_v38 }
 0x12e   : > { %v872_v47 = vadd.f32 %v871_v45, %v3877_v11  ;;  %v873_v49 = vpop.f32.mrb[14].mxu1  ;;  %3245 = vmatmul.mubr.msk.f32.gmra.mrb[38].mxu1 %vm1314_vm2, %v3941_v37  ;;  %v831_v50 = vadd.f32 %v830_v48, %v3879_v12  ;;  %3330 = vmatprep.subr.bf16.mxu1 %v3329_v39  ;;  %v832_v52 = vpop.f32.mrb[15].mxu0  ;;  %v1234_v57 = vmax.f32 %v827_v42, 0.0 }
 0x12f   : > { %v874_v51 = vadd.f32 %v873_v49, %v3879_v12  ;;  %v875_v53 = vpop.f32.mrb[15].mxu1  ;;  %v833_v54 = vadd.f32 %v832_v52, %v3879_v12  ;;  %1569 = vmatprep.mubr.f32.mxu0 %v3589_v8  ;;  %1658 = vmatprep.mubr.f32.mxu1 %v3589_v8  ;;  %v1236_v58 = vmax.f32 %v870_v43, 0.0  ;;  %v1235_v61 = vmax.f32 %v829_v46, 0.0 }
 0x130   : > { %v876_v56 = vadd.f32 %v875_v53, %v3879_v12  ;;  %v1266_v59 = vmax.f32 %v831_v50, 0.0  ;;  %v1237_v62 = vmax.f32 %v872_v47, 0.0 }
 0x131   : > { %v1268_v60 = vmax.f32 %v874_v51, 0.0  ;;  %v1267_v63 = vmax.f32 %v833_v54, 0.0  ;;  %3246 = vmatmul.mubr.msk.f32.vlgmr.msra.gmra.mrb[40].mxu0 %vm1314_vm2, %v3898_v55 }
 0x132   : > { %v1269_v1 = vmax.f32 %v876_v56, 0.0  ;;  %3250 = vmatmul.mubr.msk.f32.vlgmr.msra.gmra.mrb[40].mxu1 %vm1314_vm2, %v3898_v55  ;;  %v3961_v2 = vpack.c.bf16 %v1266_v59, %v1234_v57  ;;  %3328 = vmatpush1.bf16.msra.mxu0 %v3327_v35 }
 0x133   : > { %v3963_v3 = vpack.c.bf16 %v1268_v60, %v1236_v58  ;;  %3332 = vmatpush1.bf16.msra.mxu1 %v3331_v36  ;;  %v3333_v4 = vpack.c.bf16 %v1267_v63, %v1235_v61  ;;  %v912_v7 = vpop.f32.mrb[16].mxu0  ;;  %1575 = vmatprep.mubr.f32.mxu0 %v3589_v8 }
 0x134   : > { %v3337_v6 = vpack.c.bf16 %v1269_v1, %v1237_v62  ;;  %v955_v9 = vpop.f32.mrb[16].mxu1  ;;  %1664 = vmatprep.mubr.f32.mxu1 %v3589_v8  ;;  %v913_v0 = vadd.f32 %v912_v7, %v3877_v11  ;;  %v914_v13 = vpop.f32.mrb[17].mxu0 }
 0x135   : > { %v956_v10 = vadd.f32 %v955_v9, %v3877_v11  ;;  %v957_v14 = vpop.f32.mrb[17].mxu1  ;;  %v915_v15 = vadd.f32 %v914_v13, %v3877_v11  ;;  %v916_v17 = vpop.f32.mrb[18].mxu0  ;;  %3247 = vmatmul.mubr.msk.f32.gmra.mrb[42].mxu0 %vm1314_vm2, %v3911_v5  ;;  %3334 = vmatprep.subr.bf16.mxu0 %v3333_v4 }
 0x136   : > { %v958_v16 = vadd.f32 %v957_v14, %v3877_v11  ;;  %v959_v18 = vpop.f32.mrb[18].mxu1  ;;  %3251 = vmatmul.mubr.msk.f32.gmra.mrb[42].mxu1 %vm1314_vm2, %v3911_v5  ;;  %v917_v19 = vadd.f32 %v916_v17, %v3879_v12  ;;  %3338 = vmatprep.subr.bf16.mxu1 %v3337_v6  ;;  %v918_v21 = vpop.f32.mrb[19].mxu0  ;;  %v1238_v26 = vmax.f32 %v913_v0, 0.0 }
 0x137   : > { %v960_v20 = vadd.f32 %v959_v18, %v3879_v12  ;;  %v961_v22 = vpop.f32.mrb[19].mxu1  ;;  %v919_v23 = vadd.f32 %v918_v21, %v3879_v12  ;;  %1581 = vmatprep.mubr.f32.mxu0 %v3589_v8  ;;  %1670 = vmatprep.mubr.f32.mxu1 %v3589_v8  ;;  %v1240_v27 = vmax.f32 %v956_v10, 0.0  ;;  %v1239_v30 = vmax.f32 %v915_v15, 0.0 }
 0x138   : > { %v962_v25 = vadd.f32 %v961_v22, %v3879_v12  ;;  %v1270_v28 = vmax.f32 %v917_v19, 0.0  ;;  %v1241_v31 = vmax.f32 %v958_v16, 0.0 }
 0x139   : > { %v1272_v29 = vmax.f32 %v960_v20, 0.0  ;;  %v1271_v32 = vmax.f32 %v919_v23, 0.0  ;;  %3248 = vmatmul.mubr.msk.f32.gmra.mrb[44].mxu0 %vm1314_vm2, %v3926_v24 }
 0x13a   : > { %v1273_v33 = vmax.f32 %v962_v25, 0.0  ;;  %3252 = vmatmul.mubr.msk.f32.gmra.mrb[44].mxu1 %vm1314_vm2, %v3926_v24  ;;  %v3985_v34 = vpack.c.bf16 %v1270_v28, %v1238_v26  ;;  %1587 = vmatprep.mubr.f32.mxu0 %v3589_v8 }
 0x13b   : > { %v3987_v35 = vpack.c.bf16 %v1272_v29, %v1240_v27  ;;  %1676 = vmatprep.mubr.f32.mxu1 %v3589_v8  ;;  %v3341_v36 = vpack.c.bf16 %v1271_v32, %v1239_v30  ;;  %v998_v39 = vpop.f32.mrb[20].mxu0 }
 0x13c   : > { %v3345_v38 = vpack.c.bf16 %v1273_v33, %v1241_v31  ;;  %v1041_v40 = vpop.f32.mrb[20].mxu1  ;;  %v999_v41 = vadd.f32 %v998_v39, %v3877_v11  ;;  %v1000_v43 = vpop.f32.mrb[21].mxu0 }
 0x13d   : > { %v1042_v42 = vadd.f32 %v1041_v40, %v3877_v11  ;;  %v1043_v44 = vpop.f32.mrb[21].mxu1  ;;  %v1001_v45 = vadd.f32 %v1000_v43, %v3877_v11  ;;  %v1002_v47 = vpop.f32.mrb[22].mxu0  ;;  %3249 = vmatmul.mubr.msk.f32.gmra.mrb[46].mxu0 %vm1314_vm2, %v3941_v37 }
 0x13e   : > { %v1044_v46 = vadd.f32 %v1043_v44, %v3877_v11  ;;  %v1045_v48 = vpop.f32.mrb[22].mxu1  ;;  %3253 = vmatmul.mubr.msk.f32.gmra.mrb[46].mxu1 %vm1314_vm2, %v3941_v37  ;;  %v1003_v49 = vadd.f32 %v1002_v47, %v3879_v12  ;;  %v1004_v51 = vpop.f32.mrb[23].mxu0  ;;  %1747 = vmatprep.mubr.f32.mxu0 %v3589_v8  ;;  %v1242_v56 = vmax.f32 %v999_v41, 0.0 }
 0x13f   : > { %v1046_v50 = vadd.f32 %v1045_v48, %v3879_v12  ;;  %v1047_v52 = vpop.f32.mrb[23].mxu1  ;;  %1836 = vmatprep.mubr.f32.mxu1 %v3589_v8  ;;  %v1005_v53 = vadd.f32 %v1004_v51, %v3879_v12  ;;  %v1244_v57 = vmax.f32 %v1042_v42, 0.0  ;;  %v1243_v60 = vmax.f32 %v1001_v45, 0.0 }
 0x140   : > { %v1048_v54 = vadd.f32 %v1047_v52, %v3879_v12  ;;  %v1274_v58 = vmax.f32 %v1003_v49, 0.0  ;;  %v1245_v61 = vmax.f32 %v1044_v46, 0.0 }
 0x141   : > { %v1276_v59 = vmax.f32 %v1046_v50, 0.0  ;;  %v1275_v62 = vmax.f32 %v1005_v53, 0.0  ;;  %3254 = vmatmul.mubr.msk.f32.vlgmr.msra.gmra.mrb[48].mxu0 %vm1314_vm2, %v3898_v55 }
 0x142   : > { %v1277_v63 = vmax.f32 %v1048_v54, 0.0  ;;  %3258 = vmatmul.mubr.msk.f32.vlgmr.msra.gmra.mrb[48].mxu1 %vm1314_vm2, %v3898_v55  ;;  %v4009_v1 = vpack.c.bf16 %v1274_v58, %v1242_v56  ;;  %3336 = vmatpush1.bf16.msra.mxu0 %v3961_v2 }
 0x143   : > { %v4011_v4 = vpack.c.bf16 %v1276_v59, %v1244_v57  ;;  %3340 = vmatpush1.bf16.msra.mxu1 %v3963_v3  ;;  %v4015_v6 = vpack.c.bf16 %v1275_v62, %v1243_v60  ;;  %3342 = vmatprep.subr.bf16.mxu0 %v3341_v36  ;;  %v1084_v9 = vpop.f32.mrb[24].mxu0 }
 0x144   : > { %v4017_v7 = vpack.c.bf16 %v1277_v63, %v1245_v61  ;;  %3346 = vmatprep.subr.bf16.mxu1 %v3345_v38  ;;  %v1127_v0 = vpop.f32.mrb[24].mxu1  ;;  %v1085_v10 = vadd.f32 %v1084_v9, %v3877_v11  ;;  %v1086_v14 = vpop.f32.mrb[25].mxu0  ;;  %1753 = vmatprep.mubr.f32.mxu0 %v3589_v8 }
 0x145   : > { %v1128_v13 = vadd.f32 %v1127_v0, %v3877_v11  ;;  %v1129_v15 = vpop.f32.mrb[25].mxu1  ;;  %1842 = vmatprep.mubr.f32.mxu1 %v3589_v8  ;;  %v1087_v2 = vadd.f32 %v1086_v14, %v3877_v11  ;;  %v1088_v16 = vpop.f32.mrb[26].mxu0  ;;  %3255 = vmatmul.mubr.msk.f32.gmra.mrb[50].mxu0 %vm1314_vm2, %v3911_v5 }
 0x146   : > { %v1130_v3 = vadd.f32 %v1129_v15, %v3877_v11  ;;  %v1131_v17 = vpop.f32.mrb[26].mxu1  ;;  %3259 = vmatmul.mubr.msk.f32.gmra.mrb[50].mxu1 %vm1314_vm2, %v3911_v5  ;;  %v1089_v18 = vadd.f32 %v1088_v16, %v3879_v12  ;;  %v1090_v20 = vpop.f32.mrb[27].mxu0  ;;  %1759 = vmatprep.mubr.f32.mxu0 %v3589_v8  ;;  %v1246_v25 = vmax.f32 %v1085_v10, 0.0 }
 0x147   : > { %v1132_v19 = vadd.f32 %v1131_v17, %v3879_v12  ;;  %v1133_v21 = vpop.f32.mrb[27].mxu1  ;;  %1848 = vmatprep.mubr.f32.mxu1 %v3589_v8  ;;  %v1091_v22 = vadd.f32 %v1090_v20, %v3879_v12  ;;  %v1248_v26 = vmax.f32 %v1128_v13, 0.0  ;;  %v1247_v29 = vmax.f32 %v1087_v2, 0.0 }
 0x148   : > { %v1134_v23 = vadd.f32 %v1133_v21, %v3879_v12  ;;  %v1278_v27 = vmax.f32 %v1089_v18, 0.0  ;;  %v1249_v30 = vmax.f32 %v1130_v3, 0.0 }
 0x149   : > { %v1280_v28 = vmax.f32 %v1132_v19, 0.0  ;;  %v1279_v31 = vmax.f32 %v1091_v22, 0.0  ;;  %3256 = vmatmul.mubr.msk.f32.gmra.mrb[52].mxu0 %vm1314_vm2, %v3926_v24 }
 0x14a   : > { %v1281_v32 = vmax.f32 %v1134_v23, 0.0  ;;  %3260 = vmatmul.mubr.msk.f32.gmra.mrb[52].mxu1 %vm1314_vm2, %v3926_v24  ;;  %v4039_v33 = vpack.c.bf16 %v1278_v27, %v1246_v25  ;;  %1765 = vmatprep.mubr.f32.mxu0 %v3589_v8 }
 0x14b   : > { %v4041_v36 = vpack.c.bf16 %v1280_v28, %v1248_v26  ;;  %1854 = vmatprep.mubr.f32.mxu1 %v3589_v8  ;;  %v3357_v38 = vpack.c.bf16 %v1279_v31, %v1247_v29  ;;  %v1170_v40 = vpop.f32.mrb[28].mxu0 }
 0x14c   : > { %v3361_v39 = vpack.c.bf16 %v1281_v32, %v1249_v30  ;;  %v1213_v41 = vpop.f32.mrb[28].mxu1  ;;  %v1171_v42 = vadd.f32 %v1170_v40, %v3877_v11  ;;  %v1172_v44 = vpop.f32.mrb[29].mxu0 }
 0x14d   : > { %v1214_v43 = vadd.f32 %v1213_v41, %v3877_v11  ;;  %v1215_v45 = vpop.f32.mrb[29].mxu1  ;;  %v1173_v46 = vadd.f32 %v1172_v44, %v3877_v11  ;;  %v1174_v48 = vpop.f32.mrb[30].mxu0  ;;  %3257 = vmatmul.mubr.msk.f32.gmra.mrb[54].mxu0 %vm1314_vm2, %v3941_v37 }
 0x14e   : > { %v1216_v47 = vadd.f32 %v1215_v45, %v3877_v11  ;;  %v1217_v49 = vpop.f32.mrb[30].mxu1  ;;  %3261 = vmatmul.mubr.msk.f32.gmra.mrb[54].mxu1 %vm1314_vm2, %v3941_v37  ;;  %v1175_v50 = vadd.f32 %v1174_v48, %v3879_v12  ;;  %v1176_v52 = vpop.f32.mrb[31].mxu0  ;;  %1925 = vmatprep.mubr.f32.mxu0 %v3589_v8  ;;  %v1250_v56 = vmax.f32 %v1171_v42, 0.0 }
 0x14f   : > { %v1218_v51 = vadd.f32 %v1217_v49, %v3879_v12  ;;  %v1219_v53 = vpop.f32.mrb[31].mxu1  ;;  %2014 = vmatprep.mubr.f32.mxu1 %v3589_v8  ;;  %v1177_v11 = vadd.f32 %v1176_v52, %v3879_v12  ;;  %v1252_v57 = vmax.f32 %v1214_v43, 0.0  ;;  %v1251_v60 = vmax.f32 %v1173_v46, 0.0  ;;  %v4213_v42 = vpop.permute.xlu0 %1306 }
 0x150   : > { %v1220_v54 = vadd.f32 %v1219_v53, %v3879_v12  ;;  %v1282_v58 = vmax.f32 %v1175_v50, 0.0  ;;  %v1253_v61 = vmax.f32 %v1216_v47, 0.0 }
 0x151   : > { %v1284_v59 = vmax.f32 %v1218_v51, 0.0  ;;  %v1283_v62 = vmax.f32 %v1177_v11, 0.0  ;;  %3262 = vmatmul.mubr.msk.f32.vlgmr.msra.gmra.mrb[56].mxu0 %vm1314_vm2, %v3898_v55 }
 0x152   : > { %v1285_v63 = vmax.f32 %v1220_v54, 0.0  ;;  %3266 = vmatmul.mubr.msk.f32.vlgmr.msra.gmra.mrb[56].mxu1 %vm1314_vm2, %v3898_v55  ;;  %v4063_v9 = vpack.c.bf16 %v1282_v58, %v1250_v56  ;;  %3344 = vmatpush1.bf16.msra.mxu0 %v3985_v34 }
 0x153   : > { %v4065_v0 = vpack.c.bf16 %v1284_v59, %v1252_v57  ;;  %3348 = vmatpush1.bf16.msra.mxu1 %v3987_v35  ;;  %v3365_v12 = vpack.c.bf16 %v1283_v62, %v1251_v60  ;;  %3350 = vmatprep.subr.bf16.mxu0 %v4015_v6 }
 0x154   : > { %v3369_v10 = vpack.c.bf16 %v1285_v63, %v1253_v61  ;;  %3354 = vmatprep.subr.bf16.mxu1 %v4017_v7  ;;  %1931 = vmatprep.mubr.f32.mxu0 %v3589_v8 }
 0x155   : > { %2020 = vmatprep.mubr.f32.mxu1 %v3589_v8  ;;  %3263 = vmatmul.mubr.msk.f32.gmra.mrb[58].mxu0 %vm1314_vm2, %v3911_v5 }
 0x156   : > { %3267 = vmatmul.mubr.msk.f32.gmra.mrb[58].mxu1 %vm1314_vm2, %v3911_v5  ;;  %1937 = vmatprep.mubr.f32.mxu0 %v3589_v8 }
 0x157   : > { %2026 = vmatprep.mubr.f32.mxu1 %v3589_v8 }
 0x159   : > { %3264 = vmatmul.mubr.msk.f32.gmra.mrb[60].mxu0 %vm1314_vm2, %v3926_v24 }
 0x15a   : > { %3268 = vmatmul.mubr.msk.f32.gmra.mrb[60].mxu1 %vm1314_vm2, %v3926_v24  ;;  %1943 = vmatprep.mubr.f32.mxu0 %v3589_v8 }
 0x15b   : > { %2032 = vmatprep.mubr.f32.mxu1 %v3589_v8 }
 0x15d   : > { %3265 = vmatmul.mubr.msk.f32.gmra.mrb[62].mxu0 %vm1314_vm2, %v3941_v37 }
 0x15e   : > { %3269 = vmatmul.mubr.msk.f32.gmra.mrb[62].mxu1 %vm1314_vm2, %v3941_v37  ;;  %2103 = vmatprep.mubr.f32.mxu0 %v3589_v8 }
 0x15f   : > { %2192 = vmatprep.mubr.f32.mxu1 %v3589_v8 }
 0x161   : > { %3270 = vmatmul.mubr.msk.f32.vlgmr.msra.gmra.mrb[64].mxu0 %vm1314_vm2, %v3898_v55 }
 0x162   : > { %3274 = vmatmul.mubr.msk.f32.vlgmr.msra.gmra.mrb[64].mxu1 %vm1314_vm2, %v3898_v55  ;;  %3352 = vmatpush1.bf16.msra.mxu0 %v4009_v1  ;;  %v4191_v1 = vpop.permute.xlu1 %1296 }
 0x163   : > { %3356 = vmatpush1.bf16.msra.mxu1 %v4011_v4  ;;  %3358 = vmatprep.subr.bf16.mxu0 %v3357_v38 }
 0x164   : > { %3362 = vmatprep.subr.bf16.mxu1 %v3361_v39  ;;  %2109 = vmatprep.mubr.f32.mxu0 %v3589_v8 }
 0x165   : > { %2198 = vmatprep.mubr.f32.mxu1 %v3589_v8  ;;  %3271 = vmatmul.mubr.msk.f32.gmra.mrb[66].mxu0 %vm1314_vm2, %v3911_v5 }
 0x166   : > { %3275 = vmatmul.mubr.msk.f32.gmra.mrb[66].mxu1 %vm1314_vm2, %v3911_v5  ;;  %2115 = vmatprep.mubr.f32.mxu0 %v3589_v8  ;;  %v4193_v2 = vpop.permute.xlu1 %1301 }
 0x167   : > { %2204 = vmatprep.mubr.f32.mxu1 %v3589_v8 }
 0x169   : > { %3272 = vmatmul.mubr.msk.f32.gmra.mrb[68].mxu0 %vm1314_vm2, %v3926_v24 }
 0x16a   : > { %3276 = vmatmul.mubr.msk.f32.gmra.mrb[68].mxu1 %vm1314_vm2, %v3926_v24  ;;  %2121 = vmatprep.mubr.f32.mxu0 %v3589_v8 }
 0x16b   : > { %2210 = vmatprep.mubr.f32.mxu1 %v3589_v8 }
 0x16d   : > { %3273 = vmatmul.mubr.msk.f32.gmra.mrb[70].mxu0 %vm1314_vm2, %v3941_v37 }
 0x16e   : > { %3277 = vmatmul.mubr.msk.f32.gmra.mrb[70].mxu1 %vm1314_vm2, %v3941_v37  ;;  %2281 = vmatprep.mubr.f32.mxu0 %v3589_v8 }
 0x16f   : > { %2370 = vmatprep.mubr.f32.mxu1 %v3589_v8 }
 0x171   : > { %3278 = vmatmul.mubr.msk.f32.vlgmr.msra.gmra.mrb[72].mxu0 %vm1314_vm2, %v3898_v55 }
 0x172   : > { %3282 = vmatmul.mubr.msk.f32.vlgmr.msra.gmra.mrb[72].mxu1 %vm1314_vm2, %v3898_v55  ;;  %3360 = vmatpush1.bf16.msra.mxu0 %v4039_v33 }
 0x173   : > { %3364 = vmatpush1.bf16.msra.mxu1 %v4041_v36  ;;  %3366 = vmatprep.subr.bf16.mxu0 %v3365_v12 }
 0x174   : > { %3370 = vmatprep.subr.bf16.mxu1 %v3369_v10  ;;  %2287 = vmatprep.mubr.f32.mxu0 %v3589_v8 }
 0x175   : > { %2376 = vmatprep.mubr.f32.mxu1 %v3589_v8  ;;  %3279 = vmatmul.mubr.msk.f32.gmra.mrb[74].mxu0 %vm1314_vm2, %v3911_v5 }
 0x176   : > { %3283 = vmatmul.mubr.msk.f32.gmra.mrb[74].mxu1 %vm1314_vm2, %v3911_v5  ;;  %2293 = vmatprep.mubr.f32.mxu0 %v3589_v8 }
 0x177   : > { %2382 = vmatprep.mubr.f32.mxu1 %v3589_v8 }
 0x179   : > { %3280 = vmatmul.mubr.msk.f32.gmra.mrb[76].mxu0 %vm1314_vm2, %v3926_v24 }
 0x17a   : > { %3284 = vmatmul.mubr.msk.f32.gmra.mrb[76].mxu1 %vm1314_vm2, %v3926_v24  ;;  %2299 = vmatprep.mubr.f32.mxu0 %v3589_v8 }
 0x17b   : > { %2388 = vmatprep.mubr.f32.mxu1 %v3589_v8 }
 0x17d   : > { %3281 = vmatmul.mubr.msk.f32.gmra.mrb[78].mxu0 %vm1314_vm2, %v3941_v37 }
 0x17e   : > { %3285 = vmatmul.mubr.msk.f32.gmra.mrb[78].mxu1 %vm1314_vm2, %v3941_v37  ;;  %2459 = vmatprep.mubr.f32.mxu0 %v3589_v8 }
 0x17f   : > { %2548 = vmatprep.mubr.f32.mxu1 %v3589_v8 }
 0x181   : > { %3286 = vmatmul.mubr.msk.f32.vlgmr.msra.gmra.mrb[80].mxu0 %vm1314_vm2, %v3898_v55 }
 0x182   : > { %3290 = vmatmul.mubr.msk.f32.vlgmr.msra.gmra.mrb[80].mxu1 %vm1314_vm2, %v3898_v55  ;;  %3368 = vmatpush1.bf16.msra.mxu0 %v4063_v9 }
 0x183   : > { %3372 = vmatpush1.bf16.msra.mxu1 %v4065_v0  ;;  %2465 = vmatprep.mubr.f32.mxu0 %v3589_v8 }
 0x184   : > { %2554 = vmatprep.mubr.f32.mxu1 %v3589_v8 }
 0x185   : > { %3287 = vmatmul.mubr.msk.f32.gmra.mrb[82].mxu0 %vm1314_vm2, %v3911_v5 }
 0x186   : > { %3291 = vmatmul.mubr.msk.f32.gmra.mrb[82].mxu1 %vm1314_vm2, %v3911_v5  ;;  %2471 = vmatprep.mubr.f32.mxu0 %v3589_v8 }
 0x187   : > { %2560 = vmatprep.mubr.f32.mxu1 %v3589_v8 }
 0x189   : > { %3288 = vmatmul.mubr.msk.f32.gmra.mrb[84].mxu0 %vm1314_vm2, %v3926_v24 }
 0x18a   : > { %3292 = vmatmul.mubr.msk.f32.gmra.mrb[84].mxu1 %vm1314_vm2, %v3926_v24  ;;  %2477 = vmatprep.mubr.f32.mxu0 %v3589_v8 }
 0x18b   : > { %2566 = vmatprep.mubr.f32.mxu1 %v3589_v8 }
 0x18d   : > { %3289 = vmatmul.mubr.msk.f32.gmra.mrb[86].mxu0 %vm1314_vm2, %v3941_v37 }
 0x18e   : > { %3293 = vmatmul.mubr.msk.f32.gmra.mrb[86].mxu1 %vm1314_vm2, %v3941_v37  ;;  %2637 = vmatprep.mubr.f32.mxu0 %v3589_v8 }
 0x18f   : > { %2726 = vmatprep.mubr.f32.mxu1 %v3589_v8 }
 0x191   : > { %3294 = vmatmul.mubr.msk.f32.vlgmr.msra.gmra.mrb[88].mxu0 %vm1314_vm2, %v3898_v55 }
 0x192   : > { %3298 = vmatmul.mubr.msk.f32.vlgmr.msra.gmra.mrb[88].mxu1 %vm1314_vm2, %v3898_v55  ;;  %2643 = vmatprep.mubr.f32.mxu0 %v3589_v8 }
 0x193   : > { %2732 = vmatprep.mubr.f32.mxu1 %v3589_v8 }
 0x195   : > { %3295 = vmatmul.mubr.msk.f32.gmra.mrb[90].mxu0 %vm1314_vm2, %v3911_v5 }
 0x196   : > { %3299 = vmatmul.mubr.msk.f32.gmra.mrb[90].mxu1 %vm1314_vm2, %v3911_v5  ;;  %2649 = vmatprep.mubr.f32.mxu0 %v3589_v8 }
 0x197   : > { %2738 = vmatprep.mubr.f32.mxu1 %v3589_v8 }
 0x199   : > { %3296 = vmatmul.mubr.msk.f32.gmra.mrb[92].mxu0 %vm1314_vm2, %v3926_v24 }
 0x19a   : > { %3300 = vmatmul.mubr.msk.f32.gmra.mrb[92].mxu1 %vm1314_vm2, %v3926_v24  ;;  %2655 = vmatprep.mubr.f32.mxu0 %v3589_v8 }
 0x19b   : > { %2744 = vmatprep.mubr.f32.mxu1 %v3589_v8 }
 0x19d   : > { %3297 = vmatmul.mubr.msk.f32.gmra.mrb[94].mxu0 %vm1314_vm2, %v3941_v37 }
 0x19e   : > { %3301 = vmatmul.mubr.msk.f32.gmra.mrb[94].mxu1 %vm1314_vm2, %v3941_v37 }
 0x1f4   : > { %v1393_v55 = vpop.f32.mrb[32].mxu0 }
 0x1f5   : > { %v1482_v5 = vpop.f32.mrb[32].mxu1  ;;  %v1395_v34 = vpop.f32.mrb[33].mxu0  ;;  %v1394_v18 = vadd.f32 %v1393_v55, %v4191_v1 }
 0x1f6   : > { %v1484_v35 = vpop.f32.mrb[33].mxu1  ;;  %v1396_v3 = vadd.f32 %v1395_v34, %v4191_v1  ;;  %v1483_v19 = vadd.f32 %v1482_v5, %v4191_v1  ;;  %v4233_v5 = vpop.permute.xlu1 %1311 }
 0x1f7   : > { %v1485_v37 = vadd.f32 %v1484_v35, %v4191_v1  ;;  %v2751_v30 = vmax.f32 %v1394_v18, 0.0 }
 0x1f8   : > { %v1399_v4 = vpop.f32.mrb[34].mxu0  ;;  %v2752_v27 = vmax.f32 %v1396_v3, 0.0  ;;  %v2753_v32 = vmax.f32 %v1483_v19, 0.0 }
 0x1f9   : > { %v1488_v6 = vpop.f32.mrb[34].mxu1  ;;  %v1401_v7 = vpop.f32.mrb[35].mxu0  ;;  %v1400_v22 = vadd.f32 %v1399_v4, %v4193_v2  ;;  %v2754_v28 = vmax.f32 %v1485_v37, 0.0 }
 0x1fa   : > { %v1490_v24 = vpop.f32.mrb[35].mxu1  ;;  %v1489_v23 = vadd.f32 %v1488_v6, %v4193_v2  ;;  %v1402_v25 = vadd.f32 %v1401_v7, %v4193_v2 }
 0x1fb   : > { %v1491_v26 = vadd.f32 %v1490_v24, %v4193_v2  ;;  %v2783_v40 = vmax.f32 %v1400_v22, 0.0 }
 0x1fc   : > { %v1405_v13 = vpop.f32.mrb[36].mxu0  ;;  %v2785_v41 = vmax.f32 %v1489_v23, 0.0  ;;  %v2784_v45 = vmax.f32 %v1402_v25, 0.0 }
 0x1fd   : > { %v1494_v14 = vpop.f32.mrb[36].mxu1  ;;  %v1407_v15 = vpop.f32.mrb[37].mxu0  ;;  %v2786_v46 = vmax.f32 %v1491_v26, 0.0  ;;  %v1406_v47 = vadd.f32 %v1405_v13, %v4213_v42 }
 0x1fe   : > { %v1496_v8 = vpop.f32.mrb[37].mxu1  ;;  %v1495_v48 = vadd.f32 %v1494_v14, %v4213_v42  ;;  %v1408_v51 = vadd.f32 %v1407_v15, %v4213_v42 }
 0x1ff   : > { %v1497_v52 = vadd.f32 %v1496_v8, %v4213_v42  ;;  %v2815_v10 = vmax.f32 %v1406_v47, 0.0 }
 0x200   : > { %v4197_v16 = vpop.f32.mrb[38].mxu0  ;;  %v2817_v55 = vmax.f32 %v1495_v48, 0.0  ;;  %v2816_v4 = vmax.f32 %v1408_v51, 0.0 }
 0x201   : > { %v4199_v17 = vpop.f32.mrb[38].mxu1  ;;  %v4203_v20 = vpop.f32.mrb[39].mxu0  ;;  %v2818_v6 = vmax.f32 %v1497_v52, 0.0 }
 0x202   : > { %v4205_v21 = vpop.f32.mrb[39].mxu1 }
 0x204   : > { %v1571_v29 = vpop.f32.mrb[40].mxu0 }
 0x205   : > { %v1660_v31 = vpop.f32.mrb[40].mxu1  ;;  %v1572_v33 = vadd.f32 %v1571_v29, %v4191_v1  ;;  %v1573_v38 = vpop.f32.mrb[41].mxu0  ;;  %v1412_v29 = vadd.f32 %v4197_v16, %v4233_v5 }
 0x206   : > { %v1661_v36 = vadd.f32 %v1660_v31, %v4191_v1  ;;  %v1662_v39 = vpop.f32.mrb[41].mxu1  ;;  %v1574_v43 = vadd.f32 %v1573_v38, %v4191_v1  ;;  %v1414_v38 = vadd.f32 %v4203_v20, %v4233_v5 }
 0x207   : > { %v1663_v44 = vadd.f32 %v1662_v39, %v4191_v1  ;;  %v2755_v49 = vmax.f32 %v1572_v33, 0.0  ;;  %v1503_v39 = vadd.f32 %v4205_v21, %v4233_v5  ;;  %v2847_v48 = vmax.f32 %v1412_v29, 0.0 }
 0x208   : > { %v2757_v50 = vmax.f32 %v1661_v36, 0.0  ;;  %v2756_v53 = vmax.f32 %v1574_v43, 0.0  ;;  %v1577_v54 = vpop.f32.mrb[42].mxu0  ;;  %v2848_v51 = vmax.f32 %v1414_v38, 0.0 }
 0x209   : > { %v2758_v11 = vmax.f32 %v1663_v44, 0.0  ;;  %v1666_v56 = vpop.f32.mrb[42].mxu1  ;;  %v4221_v57 = vmax.f32 %v2751_v30, %v2755_v49  ;;  %v1578_v59 = vadd.f32 %v1577_v54, %v4193_v2  ;;  %v1579_v61 = vpop.f32.mrb[43].mxu0  ;;  %v1501_v30 = vadd.f32 %v4199_v17, %v4233_v5 }
 0x20a   : > { %v4223_v58 = vmax.f32 %v2753_v32, %v2757_v50  ;;  %v1667_v60 = vadd.f32 %v1666_v56, %v4193_v2  ;;  %v1668_v62 = vpop.f32.mrb[43].mxu1  ;;  %v4227_v63 = vmax.f32 %v2752_v27, %v2756_v53  ;;  %v1580_v0 = vadd.f32 %v1579_v61, %v4193_v2 }
 0x20b   : > { %v4229_v9 = vmax.f32 %v2754_v28, %v2758_v11  ;;  %v1669_v12 = vadd.f32 %v1668_v62, %v4193_v2  ;;  %v2787_v34 = vmax.f32 %v1578_v59, 0.0  ;;  %v2849_v49 = vmax.f32 %v1501_v30, 0.0 }
 0x20c   : > { %v2789_v35 = vmax.f32 %v1667_v60, 0.0  ;;  %v2788_v7 = vmax.f32 %v1580_v0, 0.0  ;;  %v1583_v13 = vpop.f32.mrb[44].mxu0  ;;  %v2850_v53 = vmax.f32 %v1503_v39, 0.0 }
 0x20d   : > { %v2790_v24 = vmax.f32 %v1669_v12, 0.0  ;;  %v1672_v14 = vpop.f32.mrb[44].mxu1  ;;  %v4235_v15 = vmax.f32 %v2783_v40, %v2787_v34  ;;  %v1584_v3 = vadd.f32 %v1583_v13, %v4213_v42  ;;  %v1585_v18 = vpop.f32.mrb[45].mxu0 }
 0x20e   : > { %v4237_v8 = vmax.f32 %v2785_v41, %v2789_v35  ;;  %v1673_v37 = vadd.f32 %v1672_v14, %v4213_v42  ;;  %v1674_v19 = vpop.f32.mrb[45].mxu1  ;;  %v4241_v22 = vmax.f32 %v2784_v45, %v2788_v7  ;;  %v1586_v25 = vadd.f32 %v1585_v18, %v4213_v42 }
 0x20f   : > { %v4243_v23 = vmax.f32 %v2786_v46, %v2790_v24  ;;  %v1675_v26 = vadd.f32 %v1674_v19, %v4213_v42  ;;  %v2819_v27 = vmax.f32 %v1584_v3, 0.0 }
 0x210   : > { %v2821_v28 = vmax.f32 %v1673_v37, 0.0  ;;  %v2820_v31 = vmax.f32 %v1586_v25, 0.0  ;;  %v1589_v33 = vpop.f32.mrb[46].mxu0 }
 0x211   : > { %v2822_v32 = vmax.f32 %v1675_v26, 0.0  ;;  %v1678_v36 = vpop.f32.mrb[46].mxu1  ;;  %v4255_v40 = vmax.f32 %v2815_v10, %v2819_v27  ;;  %v1590_v43 = vadd.f32 %v1589_v33, %v4233_v5  ;;  %v1591_v44 = vpop.f32.mrb[47].mxu0 }
 0x212   : > { %v4257_v41 = vmax.f32 %v2817_v55, %v2821_v28  ;;  %v1679_v16 = vadd.f32 %v1678_v36, %v4233_v5  ;;  %v1680_v17 = vpop.f32.mrb[47].mxu1  ;;  %v4261_v45 = vmax.f32 %v2816_v4, %v2820_v31  ;;  %v1592_v47 = vadd.f32 %v1591_v44, %v4233_v5 }
 0x213   : > { %v4263_v46 = vmax.f32 %v2818_v6, %v2822_v32  ;;  %v1681_v20 = vadd.f32 %v1680_v17, %v4233_v5  ;;  %v2851_v21 = vmax.f32 %v1590_v43, 0.0 }
 0x214   : > { %v2853_v50 = vmax.f32 %v1679_v16, 0.0  ;;  %v2852_v52 = vmax.f32 %v1592_v47, 0.0  ;;  %v1749_v54 = vpop.f32.mrb[48].mxu0 }
 0x215   : > { %v2854_v11 = vmax.f32 %v1681_v20, 0.0  ;;  %v1838_v56 = vpop.f32.mrb[48].mxu1  ;;  %v4267_v59 = vmax.f32 %v2847_v48, %v2851_v21  ;;  %v1750_v61 = vadd.f32 %v1749_v54, %v4191_v1  ;;  %v1751_v0 = vpop.f32.mrb[49].mxu0 }
 0x216   : > { %v4269_v60 = vmax.f32 %v2849_v49, %v2853_v50  ;;  %v1839_v62 = vadd.f32 %v1838_v56, %v4191_v1  ;;  %v1840_v12 = vpop.f32.mrb[49].mxu1  ;;  %v4273_v10 = vmax.f32 %v2848_v51, %v2852_v52  ;;  %v1752_v34 = vadd.f32 %v1751_v0, %v4191_v1 }
 0x217   : > { %v4275_v55 = vmax.f32 %v2850_v53, %v2854_v11  ;;  %v1841_v35 = vadd.f32 %v1840_v12, %v4191_v1  ;;  %v2759_v4 = vmax.f32 %v1750_v61, 0.0 }
 0x218   : > { %v2761_v6 = vmax.f32 %v1839_v62, 0.0  ;;  %v2760_v7 = vmax.f32 %v1752_v34, 0.0  ;;  %v1755_v13 = vpop.f32.mrb[50].mxu0 }
 0x219   : > { %v2762_v24 = vmax.f32 %v1841_v35, 0.0  ;;  %v1844_v14 = vpop.f32.mrb[50].mxu1  ;;  %v4280_v3 = vmax.f32 %v4221_v57, %v2759_v4  ;;  %v1756_v18 = vadd.f32 %v1755_v13, %v4193_v2  ;;  %v1757_v25 = vpop.f32.mrb[51].mxu0 }
 0x21a   : > { %v4283_v37 = vmax.f32 %v4223_v58, %v2761_v6  ;;  %v1845_v19 = vadd.f32 %v1844_v14, %v4193_v2  ;;  %v1846_v26 = vpop.f32.mrb[51].mxu1  ;;  %v4288_v27 = vmax.f32 %v4227_v63, %v2760_v7  ;;  %v1758_v29 = vadd.f32 %v1757_v25, %v4193_v2 }
 0x21b   : > { %v4291_v28 = vmax.f32 %v4229_v9, %v2762_v24  ;;  %v1847_v57 = vadd.f32 %v1846_v26, %v4193_v2  ;;  %v2791_v30 = vmax.f32 %v1756_v18, 0.0 }
 0x21c   : > { %v2793_v31 = vmax.f32 %v1845_v19, 0.0  ;;  %v2792_v58 = vmax.f32 %v1758_v29, 0.0  ;;  %v1761_v33 = vpop.f32.mrb[52].mxu0 }
 0x21d   : > { %v2794_v32 = vmax.f32 %v1847_v57, 0.0  ;;  %v1850_v36 = vpop.f32.mrb[52].mxu1  ;;  %v4296_v38 = vmax.f32 %v4235_v15, %v2791_v30  ;;  %v1762_v63 = vadd.f32 %v1761_v33, %v4213_v42  ;;  %v1763_v43 = vpop.f32.mrb[53].mxu0 }
 0x21e   : > { %v4299_v39 = vmax.f32 %v4237_v8, %v2793_v31  ;;  %v1851_v9 = vadd.f32 %v1850_v36, %v4213_v42  ;;  %v1852_v16 = vpop.f32.mrb[53].mxu1  ;;  %v4304_v44 = vmax.f32 %v4241_v22, %v2792_v58  ;;  %v1764_v47 = vadd.f32 %v1763_v43, %v4213_v42 }
 0x21f   : > { %v4307_v17 = vmax.f32 %v4243_v23, %v2794_v32  ;;  %v1853_v15 = vadd.f32 %v1852_v16, %v4213_v42  ;;  %v2823_v20 = vmax.f32 %v1762_v63, 0.0 }
 0x220   : > { %v2825_v48 = vmax.f32 %v1851_v9, 0.0  ;;  %v2824_v8 = vmax.f32 %v1764_v47, 0.0  ;;  %v1767_v49 = vpop.f32.mrb[54].mxu0 }
 0x221   : > { %v2826_v21 = vmax.f32 %v1853_v15, 0.0  ;;  %v1856_v50 = vpop.f32.mrb[54].mxu1  ;;  %v4312_v51 = vmax.f32 %v4255_v40, %v2823_v20  ;;  %v1768_v22 = vadd.f32 %v1767_v49, %v4233_v5  ;;  %v1769_v53 = vpop.f32.mrb[55].mxu0 }
 0x222   : > { %v4315_v52 = vmax.f32 %v4257_v41, %v2825_v48  ;;  %v1857_v23 = vadd.f32 %v1856_v50, %v4233_v5  ;;  %v1858_v11 = vpop.f32.mrb[55].mxu1  ;;  %v4320_v54 = vmax.f32 %v4261_v45, %v2824_v8  ;;  %v1770_v61 = vadd.f32 %v1769_v53, %v4233_v5 }
 0x223   : > { %v4323_v56 = vmax.f32 %v4263_v46, %v2826_v21  ;;  %v1859_v40 = vadd.f32 %v1858_v11, %v4233_v5  ;;  %v2855_v62 = vmax.f32 %v1768_v22, 0.0 }
 0x224   : > { %v2857_v0 = vmax.f32 %v1857_v23, 0.0  ;;  %v2856_v41 = vmax.f32 %v1770_v61, 0.0  ;;  %v1927_v34 = vpop.f32.mrb[56].mxu0 }
 0x225   : > { %v2858_v12 = vmax.f32 %v1859_v40, 0.0  ;;  %v2016_v35 = vpop.f32.mrb[56].mxu1  ;;  %v4328_v4 = vmax.f32 %v4267_v59, %v2855_v62  ;;  %v1928_v45 = vadd.f32 %v1927_v34, %v4191_v1  ;;  %v1929_v7 = vpop.f32.mrb[57].mxu0 }
 0x226   : > { %v4331_v6 = vmax.f32 %v4269_v60, %v2857_v0  ;;  %v2017_v46 = vadd.f32 %v2016_v35, %v4191_v1  ;;  %v2018_v24 = vpop.f32.mrb[57].mxu1  ;;  %v4336_v13 = vmax.f32 %v4273_v10, %v2856_v41  ;;  %v1930_v18 = vadd.f32 %v1929_v7, %v4191_v1 }
 0x227   : > { %v4339_v14 = vmax.f32 %v4275_v55, %v2858_v12  ;;  %v2019_v59 = vadd.f32 %v2018_v24, %v4191_v1  ;;  %v2763_v19 = vmax.f32 %v1928_v45, 0.0 }
 0x228   : > { %v2765_v25 = vmax.f32 %v2017_v46, 0.0  ;;  %v2764_v60 = vmax.f32 %v1930_v18, 0.0  ;;  %v1933_v29 = vpop.f32.mrb[58].mxu0 }
 0x229   : > { %v2766_v26 = vmax.f32 %v2019_v59, 0.0  ;;  %v2022_v57 = vpop.f32.mrb[58].mxu1  ;;  %v4344_v30 = vmax.f32 %v4280_v3, %v2763_v19  ;;  %v1934_v10 = vadd.f32 %v1933_v29, %v4193_v2  ;;  %v1935_v58 = vpop.f32.mrb[59].mxu0 }
 0x22a   : > { %v4347_v31 = vmax.f32 %v4283_v37, %v2765_v25  ;;  %v2023_v55 = vadd.f32 %v2022_v57, %v4193_v2  ;;  %v2024_v32 = vpop.f32.mrb[59].mxu1  ;;  %v4352_v33 = vmax.f32 %v4288_v27, %v2764_v60  ;;  %v1936_v63 = vadd.f32 %v1935_v58, %v4193_v2 }
 0x22b   : > { %v4355_v36 = vmax.f32 %v4291_v28, %v2766_v26  ;;  %v2025_v3 = vadd.f32 %v2024_v32, %v4193_v2  ;;  %v2795_v9 = vmax.f32 %v1934_v10, 0.0 }
 0x22c   : > { %v2797_v43 = vmax.f32 %v2023_v55, 0.0  ;;  %v2796_v37 = vmax.f32 %v1936_v63, 0.0  ;;  %v1939_v47 = vpop.f32.mrb[60].mxu0 }
 0x22d   : > { %v2798_v16 = vmax.f32 %v2025_v3, 0.0  ;;  %v2028_v15 = vpop.f32.mrb[60].mxu1  ;;  %v4360_v20 = vmax.f32 %v4296_v38, %v2795_v9  ;;  %v1940_v27 = vadd.f32 %v1939_v47, %v4213_v42  ;;  %v1941_v8 = vpop.f32.mrb[61].mxu0 }
 0x22e   : > { %v4363_v48 = vmax.f32 %v4299_v39, %v2797_v43  ;;  %v2029_v28 = vadd.f32 %v2028_v15, %v4213_v42  ;;  %v2030_v21 = vpop.f32.mrb[61].mxu1  ;;  %v4368_v49 = vmax.f32 %v4304_v44, %v2796_v37  ;;  %v1942_v22 = vadd.f32 %v1941_v8, %v4213_v42 }
 0x22f   : > { %v4371_v50 = vmax.f32 %v4307_v17, %v2798_v16  ;;  %v2031_v38 = vadd.f32 %v2030_v21, %v4213_v42  ;;  %v2827_v23 = vmax.f32 %v1940_v27, 0.0 }
 0x230   : > { %v2829_v53 = vmax.f32 %v2029_v28, 0.0  ;;  %v2828_v39 = vmax.f32 %v1942_v22, 0.0  ;;  %v1945_v61 = vpop.f32.mrb[62].mxu0 }
 0x231   : > { %v2830_v11 = vmax.f32 %v2031_v38, 0.0  ;;  %v2034_v40 = vpop.f32.mrb[62].mxu1  ;;  %v4376_v62 = vmax.f32 %v4312_v51, %v2827_v23  ;;  %v1946_v44 = vadd.f32 %v1945_v61, %v4233_v5  ;;  %v1947_v41 = vpop.f32.mrb[63].mxu0 }
 0x232   : > { %v4379_v0 = vmax.f32 %v4315_v52, %v2829_v53  ;;  %v2035_v17 = vadd.f32 %v2034_v40, %v4233_v5  ;;  %v2036_v12 = vpop.f32.mrb[63].mxu1  ;;  %v4384_v34 = vmax.f32 %v4320_v54, %v2828_v39  ;;  %v1948_v45 = vadd.f32 %v1947_v41, %v4233_v5 }
 0x233   : > { %v4387_v35 = vmax.f32 %v4323_v56, %v2830_v11  ;;  %v2037_v51 = vadd.f32 %v2036_v12, %v4233_v5  ;;  %v2859_v46 = vmax.f32 %v1946_v44, 0.0 }
 0x234   : > { %v2861_v7 = vmax.f32 %v2035_v17, 0.0  ;;  %v2860_v52 = vmax.f32 %v1948_v45, 0.0  ;;  %v2105_v18 = vpop.f32.mrb[64].mxu0 }
 0x235   : > { %v2862_v24 = vmax.f32 %v2037_v51, 0.0  ;;  %v2194_v59 = vpop.f32.mrb[64].mxu1  ;;  %v4392_v19 = vmax.f32 %v4328_v4, %v2859_v46  ;;  %v2106_v54 = vadd.f32 %v2105_v18, %v4191_v1  ;;  %v2107_v60 = vpop.f32.mrb[65].mxu0 }
 0x236   : > { %v4395_v25 = vmax.f32 %v4331_v6, %v2861_v7  ;;  %v2195_v56 = vadd.f32 %v2194_v59, %v4191_v1  ;;  %v2196_v26 = vpop.f32.mrb[65].mxu1  ;;  %v4400_v29 = vmax.f32 %v4336_v13, %v2860_v52  ;;  %v2108_v10 = vadd.f32 %v2107_v60, %v4191_v1 }
 0x237   : > { %v4403_v57 = vmax.f32 %v4339_v14, %v2862_v24  ;;  %v2197_v4 = vadd.f32 %v2196_v26, %v4191_v1  ;;  %v2767_v55 = vmax.f32 %v2106_v54, 0.0 }
 0x238   : > { %v2769_v58 = vmax.f32 %v2195_v56, 0.0  ;;  %v2768_v6 = vmax.f32 %v2108_v10, 0.0  ;;  %v2111_v63 = vpop.f32.mrb[66].mxu0 }
 0x239   : > { %v2770_v32 = vmax.f32 %v2197_v4, 0.0  ;;  %v2200_v3 = vpop.f32.mrb[66].mxu1  ;;  %v4408_v9 = vmax.f32 %v4344_v30, %v2767_v55  ;;  %v2112_v13 = vadd.f32 %v2111_v63, %v4193_v2  ;;  %v2113_v37 = vpop.f32.mrb[67].mxu0 }
 0x23a   : > { %v4411_v43 = vmax.f32 %v4347_v31, %v2769_v58  ;;  %v2201_v14 = vadd.f32 %v2200_v3, %v4193_v2  ;;  %v2202_v16 = vpop.f32.mrb[67].mxu1  ;;  %v4416_v47 = vmax.f32 %v4352_v33, %v2768_v6  ;;  %v2114_v27 = vadd.f32 %v2113_v37, %v4193_v2 }
 0x23b   : > { %v4419_v15 = vmax.f32 %v4355_v36, %v2770_v32  ;;  %v2203_v30 = vadd.f32 %v2202_v16, %v4193_v2  ;;  %v2799_v28 = vmax.f32 %v2112_v13, 0.0 }
 0x23c   : > { %v2801_v8 = vmax.f32 %v2201_v14, 0.0  ;;  %v2800_v31 = vmax.f32 %v2114_v27, 0.0  ;;  %v2117_v22 = vpop.f32.mrb[68].mxu0 }
 0x23d   : > { %v2802_v21 = vmax.f32 %v2203_v30, 0.0  ;;  %v2206_v38 = vpop.f32.mrb[68].mxu1  ;;  %v4424_v23 = vmax.f32 %v4360_v20, %v2799_v28  ;;  %v2118_v33 = vadd.f32 %v2117_v22, %v4213_v42  ;;  %v2119_v39 = vpop.f32.mrb[69].mxu0 }
 0x23e   : > { %v4427_v53 = vmax.f32 %v4363_v48, %v2801_v8  ;;  %v2207_v36 = vadd.f32 %v2206_v38, %v4213_v42  ;;  %v2208_v11 = vpop.f32.mrb[69].mxu1  ;;  %v4432_v61 = vmax.f32 %v4368_v49, %v2800_v31  ;;  %v2120_v44 = vadd.f32 %v2119_v39, %v4213_v42 }
 0x23f   : > { %v4435_v40 = vmax.f32 %v4371_v50, %v2802_v21  ;;  %v2209_v20 = vadd.f32 %v2208_v11, %v4213_v42  ;;  %v2831_v17 = vmax.f32 %v2118_v33, 0.0 }
 0x240   : > { %v2833_v41 = vmax.f32 %v2207_v36, 0.0  ;;  %v2832_v48 = vmax.f32 %v2120_v44, 0.0  ;;  %v2123_v45 = vpop.f32.mrb[70].mxu0 }
 0x241   : > { %v2834_v12 = vmax.f32 %v2209_v20, 0.0  ;;  %v2212_v51 = vpop.f32.mrb[70].mxu1  ;;  %v4440_v46 = vmax.f32 %v4376_v62, %v2831_v17  ;;  %v2124_v49 = vadd.f32 %v2123_v45, %v4233_v5  ;;  %v2125_v52 = vpop.f32.mrb[71].mxu0 }
 0x242   : > { %v4443_v7 = vmax.f32 %v4379_v0, %v2833_v41  ;;  %v2213_v50 = vadd.f32 %v2212_v51, %v4233_v5  ;;  %v2214_v24 = vpop.f32.mrb[71].mxu1  ;;  %v4448_v18 = vmax.f32 %v4384_v34, %v2832_v48  ;;  %v2126_v54 = vadd.f32 %v2125_v52, %v4233_v5 }
 0x243   : > { %v4451_v59 = vmax.f32 %v4387_v35, %v2834_v12  ;;  %v2215_v62 = vadd.f32 %v2214_v24, %v4233_v5  ;;  %v2863_v56 = vmax.f32 %v2124_v49, 0.0 }
 0x244   : > { %v2865_v60 = vmax.f32 %v2213_v50, 0.0  ;;  %v2864_v0 = vmax.f32 %v2126_v54, 0.0  ;;  %v2283_v10 = vpop.f32.mrb[72].mxu0 }
 0x245   : > { %v2866_v26 = vmax.f32 %v2215_v62, 0.0  ;;  %v2372_v4 = vpop.f32.mrb[72].mxu1  ;;  %v4456_v55 = vmax.f32 %v4392_v19, %v2863_v56  ;;  %v2284_v34 = vadd.f32 %v2283_v10, %v4191_v1  ;;  %v2285_v6 = vpop.f32.mrb[73].mxu0 }
 0x246   : > { %v4459_v58 = vmax.f32 %v4395_v25, %v2865_v60  ;;  %v2373_v35 = vadd.f32 %v2372_v4, %v4191_v1  ;;  %v2374_v32 = vpop.f32.mrb[73].mxu1  ;;  %v4464_v63 = vmax.f32 %v4400_v29, %v2864_v0  ;;  %v2286_v13 = vadd.f32 %v2285_v6, %v4191_v1 }
 0x247   : > { %v4467_v3 = vmax.f32 %v4403_v57, %v2866_v26  ;;  %v2375_v19 = vadd.f32 %v2374_v32, %v4191_v1  ;;  %v2771_v14 = vmax.f32 %v2284_v34, 0.0 }
 0x248   : > { %v2773_v37 = vmax.f32 %v2373_v35, 0.0  ;;  %v2772_v25 = vmax.f32 %v2286_v13, 0.0  ;;  %v2289_v27 = vpop.f32.mrb[74].mxu0 }
 0x249   : > { %v2774_v16 = vmax.f32 %v2375_v19, 0.0  ;;  %v2378_v30 = vpop.f32.mrb[74].mxu1  ;;  %v4472_v28 = vmax.f32 %v4408_v9, %v2771_v14  ;;  %v2290_v29 = vadd.f32 %v2289_v27, %v4193_v2  ;;  %v2291_v31 = vpop.f32.mrb[75].mxu0 }
 0x24a   : > { %v4475_v8 = vmax.f32 %v4411_v43, %v2773_v37  ;;  %v2379_v57 = vadd.f32 %v2378_v30, %v4193_v2  ;;  %v2380_v21 = vpop.f32.mrb[75].mxu1  ;;  %v4480_v22 = vmax.f32 %v4416_v47, %v2772_v25  ;;  %v2292_v33 = vadd.f32 %v2291_v31, %v4193_v2 }
 0x24b   : > { %v4483_v38 = vmax.f32 %v4419_v15, %v2774_v16  ;;  %v2381_v9 = vadd.f32 %v2380_v21, %v4193_v2  ;;  %v2803_v36 = vmax.f32 %v2290_v29, 0.0 }
 0x24c   : > { %v2805_v39 = vmax.f32 %v2379_v57, 0.0  ;;  %v2804_v43 = vmax.f32 %v2292_v33, 0.0  ;;  %v2295_v44 = vpop.f32.mrb[76].mxu0 }
 0x24d   : > { %v2806_v11 = vmax.f32 %v2381_v9, 0.0  ;;  %v2384_v20 = vpop.f32.mrb[76].mxu1  ;;  %v4488_v17 = vmax.f32 %v4424_v23, %v2803_v36  ;;  %v2296_v47 = vadd.f32 %v2295_v44, %v4213_v42  ;;  %v2297_v48 = vpop.f32.mrb[77].mxu0 }
 0x24e   : > { %v4491_v41 = vmax.f32 %v4427_v53, %v2805_v39  ;;  %v2385_v15 = vadd.f32 %v2384_v20, %v4213_v42  ;;  %v2386_v12 = vpop.f32.mrb[77].mxu1  ;;  %v4496_v45 = vmax.f32 %v4432_v61, %v2804_v43  ;;  %v2298_v49 = vadd.f32 %v2297_v48, %v4213_v42 }
 0x24f   : > { %v4499_v51 = vmax.f32 %v4435_v40, %v2806_v11  ;;  %v2387_v23 = vadd.f32 %v2386_v12, %v4213_v42  ;;  %v2835_v50 = vmax.f32 %v2296_v47, 0.0  ;;  %v2993_v48 = vlaneseq }
 0x250   : > { %v2837_v52 = vmax.f32 %v2385_v15, 0.0  ;;  %v2836_v53 = vmax.f32 %v2298_v49, 0.0  ;;  %v2301_v54 = vpop.f32.mrb[78].mxu0 }
 0x251   : > { %v2838_v24 = vmax.f32 %v2387_v23, 0.0  ;;  %v2390_v62 = vpop.f32.mrb[78].mxu1  ;;  %v4504_v56 = vmax.f32 %v4440_v46, %v2835_v50  ;;  %v2302_v61 = vadd.f32 %v2301_v54, %v4233_v5  ;;  %v2303_v0 = vpop.f32.mrb[79].mxu0 }
 0x252   : > { %v4507_v60 = vmax.f32 %v4443_v7, %v2837_v52  ;;  %v2391_v40 = vadd.f32 %v2390_v62, %v4233_v5  ;;  %v2392_v26 = vpop.f32.mrb[79].mxu1  ;;  %v4512_v10 = vmax.f32 %v4448_v18, %v2836_v53  ;;  %v2304_v34 = vadd.f32 %v2303_v0, %v4233_v5 }
 0x253   : > { %v4515_v4 = vmax.f32 %v4451_v59, %v2838_v24  ;;  %v2393_v46 = vadd.f32 %v2392_v26, %v4233_v5  ;;  %v2867_v35 = vmax.f32 %v2302_v61, 0.0  ;;  %v2994_v26 = vshrl.u32 %v2993_v48, 7 }
 0x254   : > { %v2869_v7 = vmax.f32 %v2391_v40, 0.0  ;;  %v2868_v6 = vmax.f32 %v2304_v34, 0.0  ;;  %v2461_v13 = vpop.f32.mrb[80].mxu0 }
 0x255   : > { %v2870_v32 = vmax.f32 %v2393_v46, 0.0  ;;  %v2550_v19 = vpop.f32.mrb[80].mxu1  ;;  %v4520_v14 = vmax.f32 %v4456_v55, %v2867_v35  ;;  %v2462_v37 = vadd.f32 %v2461_v13, %v4191_v1  ;;  %v2463_v25 = vpop.f32.mrb[81].mxu0 }
 0x256   : > { %v4523_v18 = vmax.f32 %v4459_v58, %v2869_v7  ;;  %v2551_v59 = vadd.f32 %v2550_v19, %v4191_v1  ;;  %v2552_v16 = vpop.f32.mrb[81].mxu1  ;;  %v4529_v27 = vmax.f32 %v4464_v63, %v2868_v6  ;;  %v2464_v55 = vadd.f32 %v2463_v25, %v4191_v1 }
 0x257   : > { %v4532_v30 = vmax.f32 %v4467_v3, %v2870_v32  ;;  %v2553_v58 = vadd.f32 %v2552_v16, %v4191_v1  ;;  %v2775_v29 = vmax.f32 %v2462_v37, 0.0 }
 0x258   : > { %v2777_v57 = vmax.f32 %v2551_v59, 0.0  ;;  %v2776_v31 = vmax.f32 %v2464_v55, 0.0  ;;  %v2467_v33 = vpop.f32.mrb[82].mxu0 }
 0x259   : > { %v2778_v21 = vmax.f32 %v2553_v58, 0.0  ;;  %v2556_v9 = vpop.f32.mrb[82].mxu1  ;;  %v4537_v36 = vmax.f32 %v4472_v28, %v2775_v29  ;;  %v2468_v39 = vadd.f32 %v2467_v33, %v4193_v2  ;;  %v2469_v43 = vpop.f32.mrb[83].mxu0  ;;  %v2995_v58 = vsub.s32 0, %v2994_v26 }
 0x25a   : > { %v4540_v63 = vmax.f32 %v4475_v8, %v2777_v57  ;;  %v2557_v3 = vadd.f32 %v2556_v9, %v4193_v2  ;;  %v2558_v11 = vpop.f32.mrb[83].mxu1  ;;  %v4550_v44 = vmax.f32 %v4480_v22, %v2776_v31  ;;  %v2470_v28 = vadd.f32 %v2469_v43, %v4193_v2 }
 0x25b   : > { %v4553_v20 = vmax.f32 %v4483_v38, %v2778_v21  ;;  %v2559_v8 = vadd.f32 %v2558_v11, %v4193_v2  ;;  %v2807_v47 = vmax.f32 %v2468_v39, 0.0  ;;  %v3003_v29 = vsub.s32 2, %v2994_v26 }
 0x25c   : > { %v2809_v15 = vmax.f32 %v2557_v3, 0.0  ;;  %v2808_v12 = vmax.f32 %v2470_v28, 0.0  ;;  %v2473_v23 = vpop.f32.mrb[84].mxu0  ;;  %v2999_v9 = vsub.s32 1, %v2994_v26  ;;  %v3007_v39 = vsub.s32 3, %v2994_v26 }
 0x25d   : > { %v2810_v49 = vmax.f32 %v2559_v8, 0.0  ;;  %v2562_v50 = vpop.f32.mrb[84].mxu1  ;;  %v4558_v52 = vmax.f32 %v4488_v17, %v2807_v47  ;;  %v2474_v38 = vadd.f32 %v2473_v23, %v4213_v42  ;;  %v2475_v24 = vpop.f32.mrb[85].mxu0 }
 0x25e   : > { %v4561_v22 = vmax.f32 %v4491_v41, %v2809_v15  ;;  %v2563_v53 = vadd.f32 %v2562_v50, %v4213_v42  ;;  %v2564_v54 = vpop.f32.mrb[85].mxu1  ;;  %v4567_v62 = vmax.f32 %v4496_v45, %v2808_v12  ;;  %v2476_v40 = vadd.f32 %v2475_v24, %v4213_v42 }
 0x25f   : > { %v4570_v61 = vmax.f32 %v4499_v51, %v2810_v49  ;;  %v2565_v17 = vadd.f32 %v2564_v54, %v4213_v42  ;;  %v2839_v0 = vmax.f32 %v2474_v38, 0.0 }
 0x260   : > { %v2841_v41 = vmax.f32 %v2563_v53, 0.0  ;;  %v2840_v34 = vmax.f32 %v2476_v40, 0.0  ;;  %v2479_v35 = vpop.f32.mrb[86].mxu0 }
 0x261   : > { %v2842_v46 = vmax.f32 %v2565_v17, 0.0  ;;  %v2568_v7 = vpop.f32.mrb[86].mxu1  ;;  %v4578_v45 = vmax.f32 %v4504_v56, %v2839_v0  ;;  %v2480_v6 = vadd.f32 %v2479_v35, %v4233_v5  ;;  %v2481_v13 = vpop.f32.mrb[87].mxu0 }
 0x262   : > { %v4581_v51 = vmax.f32 %v4507_v60, %v2841_v41  ;;  %v2569_v32 = vadd.f32 %v2568_v7, %v4233_v5  ;;  %v2570_v19 = vpop.f32.mrb[87].mxu1  ;;  %v4586_v37 = vmax.f32 %v4512_v10, %v2840_v34  ;;  %v2482_v25 = vadd.f32 %v2481_v13, %v4233_v5  ;;  %v2991_v60 = vld [vmem:[%s318_s15] sm:$0xf] }
 0x263   : > { %v4589_v59 = vmax.f32 %v4515_v4, %v2842_v46  ;;  %v2571_v56 = vadd.f32 %v2570_v19, %v4233_v5  ;;  %v2871_v16 = vmax.f32 %v2480_v6, 0.0  ;;  %v4609_v12 = vrot.slane %v2991_v60, %v2995_v58 }
 0x264   : > { %v2873_v55 = vmax.f32 %v2569_v32, 0.0  ;;  %v2872_v57 = vmax.f32 %v2482_v25, 0.0  ;;  %v2639_v21 = vpop.f32.mrb[88].mxu0  ;;  %v4611_v49 = vrot.slane %v2991_v60, %v3003_v29  ;;  %v4613_v50 = vrot.slane %v2991_v60, %v2999_v9 }
 0x265   : > { %v2874_v31 = vmax.f32 %v2571_v56, 0.0  ;;  %v2728_v33 = vpop.f32.mrb[88].mxu1  ;;  %v4594_v10 = vmax.f32 %v4520_v14, %v2871_v16  ;;  %v2640_v3 = vadd.f32 %v2639_v21, %v4191_v1  ;;  %v2641_v11 = vpop.f32.mrb[89].mxu0  ;;  %v4615_v53 = vrot.slane %v2991_v60, %v3007_v39 }
 0x266   : > { %v4597_v4 = vmax.f32 %v4523_v18, %v2873_v55  ;;  %v2729_v43 = vadd.f32 %v2728_v33, %v4191_v1  ;;  %v2730_v28 = vpop.f32.mrb[89].mxu1  ;;  %v4602_v8 = vmax.f32 %v4529_v27, %v2872_v57  ;;  %v2642_v15 = vadd.f32 %v2641_v11, %v4191_v1 }
 0x267   : > { %v4605_v47 = vmax.f32 %v4532_v30, %v2874_v31  ;;  %v2731_v14 = vadd.f32 %v2730_v28, %v4191_v1  ;;  %v2779_v48 = vmax.f32 %v2640_v3, 0.0 }
 0x268   : > { %v2781_v18 = vmax.f32 %v2729_v43, 0.0  ;;  %v2780_v23 = vmax.f32 %v2642_v15, 0.0  ;;  %v2645_v27 = vpop.f32.mrb[90].mxu0 }
 0x269   : > { %v2782_v38 = vmax.f32 %v2731_v14, 0.0  ;;  %v2734_v24 = vpop.f32.mrb[90].mxu1  ;;  %v2975_v30 = vmax.f32 %v4537_v36, %v2779_v48  ;;  %v2646_v1 = vadd.f32 %v2645_v27, %v4193_v2  ;;  %v2647_v17 = vpop.f32.mrb[91].mxu0 }
 0x26a   : > { %v2977_v54 = vmax.f32 %v4540_v63, %v2781_v18  ;;  %v2735_v40 = vadd.f32 %v2734_v24, %v4193_v2  ;;  %v2736_v0 = vpop.f32.mrb[91].mxu1  ;;  %v2976_v41 = vmax.f32 %v4550_v44, %v2780_v23  ;;  %v2648_v34 = vadd.f32 %v2647_v17, %v4193_v2 }
 0x26b   : > { %v2978_v26 = vmax.f32 %v4553_v20, %v2782_v38  ;;  %v2737_v46 = vadd.f32 %v2736_v0, %v4193_v2  ;;  %v3013_v35 = vmul.f32 %v4609_v12, %v2975_v30  ;;  %v2811_v63 = vmax.f32 %v2646_v1, 0.0 }
 0x26c   : > { %v3015_v36 = vmul.f32 %v4611_v49, %v2977_v54  ;;  %v2813_v7 = vmax.f32 %v2735_v40, 0.0  ;;  %v3014_v6 = vmul.f32 %v4613_v50, %v2976_v41  ;;  %v2812_v13 = vmax.f32 %v2648_v34, 0.0  ;;  %v2651_v25 = vpop.f32.mrb[92].mxu0 }
 0x26d   : > { %v3016_v32 = vmul.f32 %v4615_v53, %v2978_v26  ;;  %v2814_v19 = vmax.f32 %v2737_v46, 0.0  ;;  %v2740_v44 = vpop.f32.mrb[92].mxu1  ;;  %3029 = vst [vmem:[%s4631_s16] sm:$0xff] %v3013_v35  ;;  %v2979_v2 = vmax.f32 %v4558_v52, %v2811_v63  ;;  %v2652_v56 = vadd.f32 %v2651_v25, %v4213_v42  ;;  %v2653_v55 = vpop.f32.mrb[93].mxu0 }
 0x26e   : > { %3031 = vst [vmem:[%s4631_s16 + $0x10] sm:$0xff] %v3015_v36  ;;  %v2981_v20 = vmax.f32 %v4561_v22, %v2813_v7  ;;  %v2741_v16 = vadd.f32 %v2740_v44, %v4213_v42  ;;  %v2742_v60 = vpop.f32.mrb[93].mxu1  ;;  %3030 = vst [vmem:[%s4631_s16 + $0x8] sm:$0xff] %v3014_v6  ;;  %v2980_v58 = vmax.f32 %v4567_v62, %v2812_v13 }
 0x26f   : > { %3032 = vst [vmem:[%s4631_s16 + $0x18] sm:$0xff] %v3016_v32  ;;  %v2982_v29 = vmax.f32 %v4570_v61, %v2814_v19  ;;  %v2654_v57 = vadd.f32 %v2653_v55, %v4213_v42  ;;  %v2743_v52 = vadd.f32 %v2742_v60, %v4213_v42  ;;  %v3017_v22 = vmul.f32 %v4609_v12, %v2979_v2 }
 0x270   : > { %v3019_v31 = vmul.f32 %v4611_v49, %v2981_v20  ;;  %v2843_v21 = vmax.f32 %v2652_v56, 0.0  ;;  %v2845_v33 = vmax.f32 %v2741_v16, 0.0  ;;  %v3018_v9 = vmul.f32 %v4613_v50, %v2980_v58  ;;  %v2657_v43 = vpop.f32.mrb[94].mxu0 }
 0x271   : > { %v3020_v39 = vmul.f32 %v4615_v53, %v2982_v29  ;;  %v2844_v3 = vmax.f32 %v2654_v57, 0.0  ;;  %v2846_v62 = vmax.f32 %v2743_v52, 0.0  ;;  %v2746_v61 = vpop.f32.mrb[94].mxu1  ;;  %3033 = vst [vmem:[%s4631_s16 + $0x20] sm:$0xff] %v3017_v22  ;;  %v2658_v28 = vadd.f32 %v2657_v43, %v4233_v5  ;;  %v2659_v14 = vpop.f32.mrb[95].mxu0 }
 0x272   : > { %3035 = vst [vmem:[%s4631_s16 + $0x30] sm:$0xff] %v3019_v31  ;;  %v2983_v42 = vmax.f32 %v4578_v45, %v2843_v21  ;;  %v2985_v11 = vmax.f32 %v4581_v51, %v2845_v33  ;;  %v2747_v15 = vadd.f32 %v2746_v61, %v4233_v5  ;;  %v2748_v48 = vpop.f32.mrb[95].mxu1  ;;  %3034 = vst [vmem:[%s4631_s16 + $0x28] sm:$0xff] %v3018_v9 }
 0x273   : > { %3036 = vst [vmem:[%s4631_s16 + $0x38] sm:$0xff] %v3020_v39  ;;  %v2984_v18 = vmax.f32 %v4586_v37, %v2844_v3  ;;  %v2986_v23 = vmax.f32 %v4589_v59, %v2846_v62  ;;  %v2660_v45 = vadd.f32 %v2659_v14, %v4233_v5  ;;  %v2749_v51 = vadd.f32 %v2748_v48, %v4233_v5 }
 0x274   : > { %v3021_v38 = vmul.f32 %v4609_v12, %v2983_v42  ;;  %v3023_v27 = vmul.f32 %v4611_v49, %v2985_v11  ;;  %v2875_v24 = vmax.f32 %v2658_v28, 0.0  ;;  %v2877_v30 = vmax.f32 %v2747_v15, 0.0 }
 0x275   : > { %v3022_v54 = vmul.f32 %v4613_v50, %v2984_v18  ;;  %v3024_v1 = vmul.f32 %v4615_v53, %v2986_v23  ;;  %v2876_v40 = vmax.f32 %v2660_v45, 0.0  ;;  %v2878_v37 = vmax.f32 %v2749_v51, 0.0 }
 0x276   : > { %3037 = vst [vmem:[%s4631_s16 + $0x40] sm:$0xff] %v3021_v38  ;;  %3039 = vst [vmem:[%s4631_s16 + $0x50] sm:$0xff] %v3023_v27  ;;  %v2987_v5 = vmax.f32 %v4594_v10, %v2875_v24  ;;  %v2989_v59 = vmax.f32 %v4597_v4, %v2877_v30 }
 0x277   : > { %3038 = vst [vmem:[%s4631_s16 + $0x48] sm:$0xff] %v3022_v54  ;;  %3040 = vst [vmem:[%s4631_s16 + $0x58] sm:$0xff] %v3024_v1  ;;  %v2988_v17 = vmax.f32 %v4602_v8, %v2876_v40  ;;  %v2990_v0 = vmax.f32 %v4605_v47, %v2878_v37 }
 0x278   : > { %v3025_v41 = vmul.f32 %v4609_v12, %v2987_v5  ;;  %v3027_v26 = vmul.f32 %v4611_v49, %v2989_v59 }
 0x279   : > { %v3026_v10 = vmul.f32 %v4613_v50, %v2988_v17  ;;  %v3028_v4 = vmul.f32 %v4615_v53, %v2990_v0 }
 0x27a   : > { %3041 = vst [vmem:[%s4631_s16 + $0x60] sm:$0xff] %v3025_v41  ;;  %3043 = vst [vmem:[%s4631_s16 + $0x70] sm:$0xff] %v3027_v26 }
 0x27b   : > { %3042 = vst [vmem:[%s4631_s16 + $0x68] sm:$0xff] %v3026_v10  ;;  %3044 = vst [vmem:[%s4631_s16 + $0x78] sm:$0xff] %v3028_v4 }
 0x27c   : > { %3516 = shalt.err (!%p3513_p4)
}
 0x27d   : > { %s3517_s9 = scalar_lea.hbm %s4680_s19, 2048  ;;  %s3521_s16 = scalar_lea.hbm %s4743_s6, 4096 }
 0x27e   : > { %p3518_p10 = scmp.ne.s32.totalorder %s4680_s19, %s3517_s9  ;;  %p3522_p2 = scmp.lt.u32.totalorder %s4680_s19, %s4743_s6 }
 0x27f   : > { %p3523_p5 = scmp.lt.u32.totalorder %s3521_s16, %s3517_s9  ;;  %p3525_p9 = scmp.lt.u32.totalorder %s3517_s9, %s4680_s19 }
 0x280   : > { %p3519_p12 = pnand %p3518_p10, %p4752_p11 }
 0x281   : > { %p3524_p8 = por %p3523_p5, %p3522_p2 }
 0x282   : > { %p3520_p1 = pneg %p3519_p12 }
 0x283   : > { %p3526_p0 = por %p3525_p9, %p3524_p8 }
 0x285   : > { %p3527_p7 = pnand %p3526_p0, %p3520_p1 }
 0x287   : > { %3530 = shalt.err (!%p3527_p7)
}
 0x288   : > { %s3591_s17 = smov 512   ;;  %s3592_s7 = smov 32  }
 0x289   : > { %3375 = dma.vmem_to_hbm [thread:$0]  (%p4752_p11), %s4682_s13, 2048, %s4680_s19, %s3046_s8, %s3591_s17, %s3591_s17, %s3592_s7  }
 0x28a PF: > { %s3076_s27 = sand.u32 1, %s3565_s21   ;;  %p4753_p13 = scmp.ne.s32.totalorder %s4748_s12, 0 }
 0x28b   : > { %p4754_p3 = scmp.ge.s32.totalorder %s3585_s26, 2  ;;  %s3077_s18 = scalar_lea.sflag [#allocation4], %s3076_s27 }
 0x28d   : > { %p3382_p6 = pnand %p4754_p3, %p4753_p13 }
 0x28f   : > { %3560 = dma.done.wait (!%p3382_p6), %s3077_s18, 2048  }
 0x290   : > { %3562 = vsyncadd (!%p3382_p6), %s3077_s18, 4294965248  ;;  %s22_s26 = sadd.s32 1, %s3585_s26   ;;  %s4755_s21 = smov %s3569_s22 }
 0x291   : > { %p19_p4 = scmp.ge.s32.totalorder %s22_s26, 4   ;;  %s4756_s22 = smov %s3573_s23 }
 0x292   : > { %s4757_s23 = smov %s3684_s11  ;;  %s4758_s24 = smov %s3581_s25 }
 0x293   : > { %s4759_s25 = smov %s4761_s29  ;;  %21 = sbr.rel (!%p19_p4) target bundleno = 6 (0x6), region = 92 }
 0x29a   :  { %3082 = vsyncpa [#allocation3], 1 }
 0x29b   :  { %3084 = vsyncpa [#allocation3 + $0x1], 1 }
 0x29c   :  { %3085 = vsyncpa [#allocation4], 1 }
 0x29d   :  { %3087 = vsyncpa [#allocation4 + $0x1], 1 }

</bundles_post_ra>
